<compile_context>
chip_gen: v7x
topology: tpu7x:2x2x1
jax: 0.10.0
libtpu: 0.0.40
codegen_flags: <defaults>
</compile_context>

<pallas_src>
import math
import functools

import jax
import jax.numpy as jnp
from jax.experimental import pallas as pl
from jax.experimental.pallas import tpu as pltpu

# ---------------- model hyper-params (small, consistent with the module) ----
B = 2          # batch
S = 8          # sequence length
D_MODEL = 32   # d_model
N_HEADS = 4    # n_heads
D_K = D_MODEL // N_HEADS
D_FF = 64      # d_ff
G = B * N_HEADS            # fused (batch, head) leading-batch dim, g = b*H + h
LN_EPS = 1e-5


def _layernorm(x, gamma, beta):
    mu = jnp.mean(x, axis=-1, keepdims=True)
    var = jnp.mean((x - mu) ** 2, axis=-1, keepdims=True)
    return (x - mu) * jax.lax.rsqrt(var + LN_EPS) * gamma + beta


def encoder_layer_kernel(
    src_ref, maskb_ref,
    wq_ref, bq_ref, wk_ref, bk_ref, wv_ref, bv_ref, wo_ref, bo_ref,
    w1_ref, b1_ref, w2_ref, b2_ref,
    g1_ref, be1_ref, g2_ref, be2_ref,
    out_ref,
):
    f32 = jnp.float32
    bf16 = jnp.bfloat16

    x = src_ref[...].astype(f32)                       # (B, S, D)

    # ---- hoisted, read-once parameter values --------------------------------
    bq = bq_ref[...]                                   # (G, 1, D_K)  f32
    bk = bk_ref[...]
    bv = bv_ref[...]
    bo = bo_ref[...]                                   # (1, D)       f32
    b1 = b1_ref[...]                                   # (1, D_FF)    f32
    b2 = b2_ref[...]                                   # (1, D)       f32
    mask_bias = maskb_ref[...]                         # (G, S, S)    f32 additive

    # ---- multi-head self-attention ------------------------------------------
    # Broadcast tokens over the fused (batch, head) dim: outer-dim only (no relayout).
    x_g = jnp.broadcast_to(x[:, None], (B, N_HEADS, S, D_MODEL)).reshape(G, S, D_MODEL)
    x_g_bf = x_g.astype(bf16)

    # QKV projections: single leading-batch einsum each (weights pre-split per head
    # and pre-transposed on the host).  bf16 operands, f32 accumulation.
    q = jnp.einsum('gsd,gdk->gsk', x_g_bf, wq_ref[...],
                   preferred_element_type=f32) + bq          # (G, S, D_K)
    k = jnp.einsum('gsd,gdk->gsk', x_g_bf, wk_ref[...],
                   preferred_element_type=f32) + bk
    v = jnp.einsum('gsd,gdk->gsk', x_g_bf, wv_ref[...],
                   preferred_element_type=f32) + bv

    scale = 1.0 / math.sqrt(D_K)
    scores = jnp.einsum('gqd,gkd->gqk', q.astype(bf16), k.astype(bf16),
                        preferred_element_type=f32) * scale   # (G, S, S)
    scores = scores + mask_bias                               # additive mask (no cmp/select)

    # softmax in f32: exp on EUP, approx reciprocal on EUP (off the VALU path)
    m = jnp.max(scores, axis=-1, keepdims=True)
    e = jnp.exp(scores - m)
    p = e * pl.reciprocal(jnp.sum(e, axis=-1, keepdims=True), approx=True)

    ctx = jnp.einsum('gqk,gkd->gqd', p.astype(bf16), v.astype(bf16),
                     preferred_element_type=f32)              # (G, S, D_K)

    # Output projection: per-head partial W_O, then reduce over the head (outer) dim.
    attn_g = jnp.einsum('gsk,gkd->gsd', ctx.astype(bf16), wo_ref[...],
                        preferred_element_type=f32)           # (G, S, D)
    attn_out = jnp.sum(attn_g.reshape(B, N_HEADS, S, D_MODEL), axis=1) + bo  # (B, S, D)

    # ---- residual + layernorm 1 ---------------------------------------------
    h1 = _layernorm(x + attn_out, g1_ref[...], be1_ref[...])  # f32 (B, S, D)

    # ---- position-wise FFN (weights broadcast once over the batch dim) -------
    w1b = jnp.broadcast_to(w1_ref[...][None], (B, D_MODEL, D_FF))   # bf16
    w2b = jnp.broadcast_to(w2_ref[...][None], (B, D_FF, D_MODEL))   # bf16
    f = jnp.einsum('bsd,bdf->bsf', h1.astype(bf16), w1b,
                   preferred_element_type=f32) + b1
    f = jnp.maximum(f, 0.0)
    f = jnp.einsum('bsf,bfd->bsd', f.astype(bf16), w2b,
                   preferred_element_type=f32) + b2

    # ---- residual + layernorm 2 ---------------------------------------------
    out = _layernorm(h1 + f, g2_ref[...], be2_ref[...])
    out_ref[...] = out.astype(out_ref.dtype)


@jax.jit
def encoder_layer(src, src_mask, params):
    """src: (B, S, D_MODEL) f32, src_mask: (B, S, S) of {0,1}."""
    (wq, bq, wk, bk, wv, bv, wo, bo, w1, b1, w2, b2, g1, be1, g2, be2) = params

    # ---- host-side (XLA) preprocessing: all transposes / head splits are free here
    def split_qkv_w(w):
        # torch Linear weight (out, in): y = x @ W.T.  Split the OUT dim into heads
        # and replicate over batch -> (G, d_model, d_k), bf16 for the MXU.
        wh = jnp.transpose(w.T.reshape(D_MODEL, N_HEADS, D_K), (1, 0, 2))     # (H, D, D_K)
        wg = jnp.broadcast_to(wh[None], (B, N_HEADS, D_MODEL, D_K)).reshape(G, D_MODEL, D_K)
        return wg.astype(jnp.bfloat16)

    def split_qkv_b(bvec):
        bh = bvec.reshape(N_HEADS, 1, D_K)
        return jnp.broadcast_to(bh[None], (B, N_HEADS, 1, D_K)).reshape(G, 1, D_K)

    wq_g, wk_g, wv_g = split_qkv_w(wq), split_qkv_w(wk), split_qkv_w(wv)
    bq_g, bk_g, bv_g = split_qkv_b(bq), split_qkv_b(bk), split_qkv_b(bv)

    # W_O: y = ctx @ W_O.T ; per-head partial is rows [h*D_K:(h+1)*D_K] of W_O.T.
    wo_h = wo.T.reshape(N_HEADS, D_K, D_MODEL)
    wo_g = jnp.broadcast_to(wo_h[None], (B, N_HEADS, D_K, D_MODEL)) \
              .reshape(G, D_K, D_MODEL).astype(jnp.bfloat16)

    w1_t = w1.T.astype(jnp.bfloat16)      # (D_MODEL, D_FF)
    w2_t = w2.T.astype(jnp.bfloat16)      # (D_FF, D_MODEL)

    # Additive mask bias, replicated per head: 0 where mask==1, -1e9 where mask==0.
    mask_bias = (src_mask.astype(jnp.float32) - 1.0) * 1e9                    # (B, S, S)
    mask_g = jnp.broadcast_to(mask_bias[:, None], (B, N_HEADS, S, S)).reshape(G, S, S)

    args = (src, mask_g, wq_g, bq_g, wk_g, bk_g, wv_g, bv_g, wo_g, bo,
            w1_t, b1, w2_t, b2, g1, be1, g2, be2)

    vmem = lambda: pl.BlockSpec(memory_space=pltpu.MemorySpace.VMEM)
    return pl.pallas_call(
        encoder_layer_kernel,
        out_shape=jax.ShapeDtypeStruct((B, S, D_MODEL), src.dtype),
        in_specs=[vmem() for _ in args],
        out_specs=vmem(),
    )(*args)


# ---------------- pure-JAX f32 reference (sanity check) ----------------------
def encoder_layer_ref(src, src_mask, params):
    (wq, bq, wk, bk, wv, bv, wo, bo, w1, b1, w2, b2, g1, be1, g2, be2) = params
    x = src
    q = x @ wq.T + bq
    k = x @ wk.T + bk
    v = x @ wv.T + bv

    def split_heads(t):  # (B,S,D) -> (B,H,S,D_K)
        return t.reshape(B, S, N_HEADS, D_K).transpose(0, 2, 1, 3)

    qh, kh, vh = split_heads(q), split_heads(k), split_heads(v)
    scores = jnp.einsum("bhqd,bhkd->bhqk", qh, kh) / math.sqrt(D_K)
    scores = jnp.where(src_mask[:, None, :, :] == 0, -1e9, scores)
    attn = jax.nn.softmax(scores, axis=-1)
    ctx = jnp.einsum("bhqk,bhkd->bhqd", attn, vh)
    ctx = ctx.transpose(0, 2, 1, 3).reshape(B, S, D_MODEL)
    attn_out = ctx @ wo.T + bo

    def ln(t, g, b):
        mu = t.mean(-1, keepdims=True)
        var = ((t - mu) ** 2).mean(-1, keepdims=True)
        return (t - mu) / jnp.sqrt(var + LN_EPS) * g + b

    h1 = ln(x + attn_out, g1[0], be1[0])
    f = jnp.maximum(h1 @ w1.T + b1, 0.0) @ w2.T + b2
    return ln(h1 + f, g2[0], be2[0])


def make_params(key):
    ks = jax.random.split(key, 8)
    scale = 0.05
    wq = scale * jax.random.normal(ks[0], (D_MODEL, D_MODEL), jnp.float32)
    wk = scale * jax.random.normal(ks[1], (D_MODEL, D_MODEL), jnp.float32)
    wv = scale * jax.random.normal(ks[2], (D_MODEL, D_MODEL), jnp.float32)
    wo = scale * jax.random.normal(ks[3], (D_MODEL, D_MODEL), jnp.float32)
    w1 = scale * jax.random.normal(ks[4], (D_FF, D_MODEL), jnp.float32)
    w2 = scale * jax.random.normal(ks[5], (D_MODEL, D_FF), jnp.float32)
    bq = 0.01 * jax.random.normal(ks[6], (1, D_MODEL), jnp.float32)
    bk = jnp.full((1, D_MODEL), 0.02, jnp.float32)
    bv = jnp.full((1, D_MODEL), -0.01, jnp.float32)
    bo = jnp.full((1, D_MODEL), 0.005, jnp.float32)
    b1 = jnp.full((1, D_FF), 0.01, jnp.float32)
    b2 = jnp.full((1, D_MODEL), -0.02, jnp.float32)
    g1 = jnp.ones((1, D_MODEL), jnp.float32)
    be1 = jnp.zeros((1, D_MODEL), jnp.float32)
    g2 = jnp.ones((1, D_MODEL), jnp.float32)
    be2 = jnp.zeros((1, D_MODEL), jnp.float32)
    return (wq, bq, wk, bk, wv, bv, wo, bo, w1, b1, w2, b2, g1, be1, g2, be2)


if __name__ == "__main__":
    key = jax.random.PRNGKey(0)
    k_src, k_params = jax.random.split(key)

    src = jax.random.normal(k_src, (B, S, D_MODEL), jnp.float32)

    # padding-style mask: batch 0 attends to all 8 positions, batch 1 to first 6
    lengths = jnp.array([8, 6], dtype=jnp.int32)
    key_pos = jnp.arange(S)[None, None, :]                  # (1,1,S)
    src_mask = (key_pos < lengths[:, None, None]).astype(jnp.float32)
    src_mask = jnp.broadcast_to(src_mask, (B, S, S))        # (B,S,S)

    params = make_params(k_params)

    out = encoder_layer(src, src_mask, params)
    out = jax.block_until_ready(out)

    ref = encoder_layer_ref(src, src_mask, params)
    assert out.shape == (B, S, D_MODEL)
    # bf16 MXU operands + approx reciprocal vs. the pure-f32 reference -> bf16-level tolerance.
    assert jnp.allclose(out, ref, atol=3e-2, rtol=3e-2)

    print("KERNEL_OK")
</pallas_src>

<mosaic_0001>
module attributes {stable_mosaic.version = 11 : i64} {
  func.func @encoder_layer_kernel(%arg0: memref<2x8x32xf32, #tpu.memory_space<vmem>>, %arg1: memref<8x8x8xf32, #tpu.memory_space<vmem>>, %arg2: memref<8x32x8xbf16, #tpu.memory_space<vmem>>, %arg3: memref<8x1x8xf32, #tpu.memory_space<vmem>>, %arg4: memref<8x32x8xbf16, #tpu.memory_space<vmem>>, %arg5: memref<8x1x8xf32, #tpu.memory_space<vmem>>, %arg6: memref<8x32x8xbf16, #tpu.memory_space<vmem>>, %arg7: memref<8x1x8xf32, #tpu.memory_space<vmem>>, %arg8: memref<8x8x32xbf16, #tpu.memory_space<vmem>>, %arg9: memref<1x32xf32, #tpu.memory_space<vmem>>, %arg10: memref<32x64xbf16, #tpu.memory_space<vmem>>, %arg11: memref<1x64xf32, #tpu.memory_space<vmem>>, %arg12: memref<64x32xbf16, #tpu.memory_space<vmem>>, %arg13: memref<1x32xf32, #tpu.memory_space<vmem>>, %arg14: memref<1x32xf32, #tpu.memory_space<vmem>>, %arg15: memref<1x32xf32, #tpu.memory_space<vmem>>, %arg16: memref<1x32xf32, #tpu.memory_space<vmem>>, %arg17: memref<1x32xf32, #tpu.memory_space<vmem>>, %arg18: memref<2x8x32xf32, #tpu.memory_space<vmem>>) attributes {dimension_semantics = [], scalar_prefetch = 0 : i64, scratch_operands = 0 : i64, tpu.core_type = #tpu.core_type<tc>} {
    %c0 = arith.constant 0 : index
    %c0_0 = arith.constant 0 : index
    %c0_1 = arith.constant 0 : index
    %0 = vector.load %arg0[%c0, %c0_0, %c0_1] : memref<2x8x32xf32, #tpu.memory_space<vmem>>, vector<2x8x32xf32>
    %c0_2 = arith.constant 0 : index
    %c0_3 = arith.constant 0 : index
    %c0_4 = arith.constant 0 : index
    %1 = vector.load %arg3[%c0_2, %c0_3, %c0_4] : memref<8x1x8xf32, #tpu.memory_space<vmem>>, vector<8x1x8xf32>
    %c0_5 = arith.constant 0 : index
    %c0_6 = arith.constant 0 : index
    %c0_7 = arith.constant 0 : index
    %2 = vector.load %arg5[%c0_5, %c0_6, %c0_7] : memref<8x1x8xf32, #tpu.memory_space<vmem>>, vector<8x1x8xf32>
    %c0_8 = arith.constant 0 : index
    %c0_9 = arith.constant 0 : index
    %c0_10 = arith.constant 0 : index
    %3 = vector.load %arg7[%c0_8, %c0_9, %c0_10] : memref<8x1x8xf32, #tpu.memory_space<vmem>>, vector<8x1x8xf32>
    %c0_11 = arith.constant 0 : index
    %c0_12 = arith.constant 0 : index
    %4 = vector.load %arg9[%c0_11, %c0_12] : memref<1x32xf32, #tpu.memory_space<vmem>>, vector<1x32xf32>
    %c0_13 = arith.constant 0 : index
    %c0_14 = arith.constant 0 : index
    %5 = vector.load %arg11[%c0_13, %c0_14] : memref<1x64xf32, #tpu.memory_space<vmem>>, vector<1x64xf32>
    %c0_15 = arith.constant 0 : index
    %c0_16 = arith.constant 0 : index
    %6 = vector.load %arg13[%c0_15, %c0_16] : memref<1x32xf32, #tpu.memory_space<vmem>>, vector<1x32xf32>
    %c0_17 = arith.constant 0 : index
    %c0_18 = arith.constant 0 : index
    %c0_19 = arith.constant 0 : index
    %7 = vector.load %arg1[%c0_17, %c0_18, %c0_19] : memref<8x8x8xf32, #tpu.memory_space<vmem>>, vector<8x8x8xf32>
    %8 = vector.shape_cast %0 : vector<2x8x32xf32> to vector<2x1x8x32xf32>
    %9 = vector.shape_cast %8 : vector<2x1x8x32xf32> to vector<2x1x8x32xf32>
    %10 = vector.broadcast %9 : vector<2x1x8x32xf32> to vector<2x4x8x32xf32>
    %11 = vector.shape_cast %10 : vector<2x4x8x32xf32> to vector<8x8x32xf32>
    %12 = arith.truncf %11 : vector<8x8x32xf32> to vector<8x8x32xbf16>
    %c0_20 = arith.constant 0 : index
    %c0_21 = arith.constant 0 : index
    %c0_22 = arith.constant 0 : index
    %13 = vector.load %arg2[%c0_20, %c0_21, %c0_22] : memref<8x32x8xbf16, #tpu.memory_space<vmem>>, vector<8x32x8xbf16>
    "tpu.trace_start"() <{level = 10 : i32, message = "gsd,gdk->gsk"}> : () -> ()
    %cst = arith.constant dense<0.000000e+00> : vector<8x8x8xf32>
    %14 = tpu.matmul %12, %13, %cst {dimension_numbers = #tpu.dot_dimension_numbers<[2], [1], [1], [2], [0, 0, 0, 1, 1, 2], [0], [0]>} : vector<8x8x32xbf16>, vector<8x32x8xbf16>, vector<8x8x8xf32> -> vector<8x8x8xf32>
    "tpu.trace_stop"() : () -> ()
    %15 = vector.broadcast %1 : vector<8x1x8xf32> to vector<8x8x8xf32>
    %16 = arith.addf %14, %15 : vector<8x8x8xf32>
    %c0_23 = arith.constant 0 : index
    %c0_24 = arith.constant 0 : index
    %c0_25 = arith.constant 0 : index
    %17 = vector.load %arg4[%c0_23, %c0_24, %c0_25] : memref<8x32x8xbf16, #tpu.memory_space<vmem>>, vector<8x32x8xbf16>
    "tpu.trace_start"() <{level = 10 : i32, message = "gsd,gdk->gsk"}> : () -> ()
    %cst_26 = arith.constant dense<0.000000e+00> : vector<8x8x8xf32>
    %18 = tpu.matmul %12, %17, %cst_26 {dimension_numbers = #tpu.dot_dimension_numbers<[2], [1], [1], [2], [0, 0, 0, 1, 1, 2], [0], [0]>} : vector<8x8x32xbf16>, vector<8x32x8xbf16>, vector<8x8x8xf32> -> vector<8x8x8xf32>
    "tpu.trace_stop"() : () -> ()
    %19 = vector.broadcast %2 : vector<8x1x8xf32> to vector<8x8x8xf32>
    %20 = arith.addf %18, %19 : vector<8x8x8xf32>
    %c0_27 = arith.constant 0 : index
    %c0_28 = arith.constant 0 : index
    %c0_29 = arith.constant 0 : index
    %21 = vector.load %arg6[%c0_27, %c0_28, %c0_29] : memref<8x32x8xbf16, #tpu.memory_space<vmem>>, vector<8x32x8xbf16>
    "tpu.trace_start"() <{level = 10 : i32, message = "gsd,gdk->gsk"}> : () -> ()
    %cst_30 = arith.constant dense<0.000000e+00> : vector<8x8x8xf32>
    %22 = tpu.matmul %12, %21, %cst_30 {dimension_numbers = #tpu.dot_dimension_numbers<[2], [1], [1], [2], [0, 0, 0, 1, 1, 2], [0], [0]>} : vector<8x8x32xbf16>, vector<8x32x8xbf16>, vector<8x8x8xf32> -> vector<8x8x8xf32>
    "tpu.trace_stop"() : () -> ()
    %23 = vector.broadcast %3 : vector<8x1x8xf32> to vector<8x8x8xf32>
    %24 = arith.addf %22, %23 : vector<8x8x8xf32>
    %25 = arith.truncf %16 : vector<8x8x8xf32> to vector<8x8x8xbf16>
    %26 = arith.truncf %20 : vector<8x8x8xf32> to vector<8x8x8xbf16>
    "tpu.trace_start"() <{level = 10 : i32, message = "gqd,gkd->gqk"}> : () -> ()
    %cst_31 = arith.constant dense<0.000000e+00> : vector<8x8x8xf32>
    %27 = tpu.matmul %25, %26, %cst_31 {dimension_numbers = #tpu.dot_dimension_numbers<[2], [2], [1], [1], [0, 0, 0, 1, 1, 1], [0], [0]>} : vector<8x8x8xbf16>, vector<8x8x8xbf16>, vector<8x8x8xf32> -> vector<8x8x8xf32>
    "tpu.trace_stop"() : () -> ()
    %cst_32 = arith.constant 0.353553385 : f32
    %28 = vector.broadcast %cst_32 : f32 to vector<8x8x8xf32>
    %29 = arith.mulf %27, %28 : vector<8x8x8xf32>
    %30 = arith.addf %29, %7 : vector<8x8x8xf32>
    %cst_33 = arith.constant dense<0xFF800000> : vector<8x8xf32>
    %31 = vector.multi_reduction <maximumf>, %30, %cst_33 [2] : vector<8x8x8xf32> to vector<8x8xf32>
    %32 = vector.shape_cast %31 : vector<8x8xf32> to vector<8x8x1xf32>
    %33 = vector.broadcast %32 : vector<8x8x1xf32> to vector<8x8x8xf32>
    %34 = arith.subf %30, %33 : vector<8x8x8xf32>
    %35 = math.exp %34 : vector<8x8x8xf32>
    %cst_34 = arith.constant dense<0.000000e+00> : vector<8x8xf32>
    %36 = vector.multi_reduction <add>, %35, %cst_34 [2] : vector<8x8x8xf32> to vector<8x8xf32>
    %37 = vector.shape_cast %36 : vector<8x8xf32> to vector<8x8x1xf32>
    %38 = tpu.reciprocal %37 {approx = true} : vector<8x8x1xf32> -> vector<8x8x1xf32>
    %39 = vector.broadcast %38 : vector<8x8x1xf32> to vector<8x8x8xf32>
    %40 = arith.mulf %35, %39 : vector<8x8x8xf32>
    %41 = arith.truncf %40 : vector<8x8x8xf32> to vector<8x8x8xbf16>
    %42 = arith.truncf %24 : vector<8x8x8xf32> to vector<8x8x8xbf16>
    "tpu.trace_start"() <{level = 10 : i32, message = "gqk,gkd->gqd"}> : () -> ()
    %cst_35 = arith.constant dense<0.000000e+00> : vector<8x8x8xf32>
    %43 = tpu.matmul %41, %42, %cst_35 {dimension_numbers = #tpu.dot_dimension_numbers<[2], [1], [1], [2], [0, 0, 0, 1, 1, 2], [0], [0]>} : vector<8x8x8xbf16>, vector<8x8x8xbf16>, vector<8x8x8xf32> -> vector<8x8x8xf32>
    "tpu.trace_stop"() : () -> ()
    %44 = arith.truncf %43 : vector<8x8x8xf32> to vector<8x8x8xbf16>
    %c0_36 = arith.constant 0 : index
    %c0_37 = arith.constant 0 : index
    %c0_38 = arith.constant 0 : index
    %45 = vector.load %arg8[%c0_36, %c0_37, %c0_38] : memref<8x8x32xbf16, #tpu.memory_space<vmem>>, vector<8x8x32xbf16>
    "tpu.trace_start"() <{level = 10 : i32, message = "gsk,gkd->gsd"}> : () -> ()
    %cst_39 = arith.constant dense<0.000000e+00> : vector<8x8x32xf32>
    %46 = tpu.matmul %44, %45, %cst_39 {dimension_numbers = #tpu.dot_dimension_numbers<[2], [1], [1], [2], [0, 0, 0, 1, 1, 2], [0], [0]>} : vector<8x8x8xbf16>, vector<8x8x32xbf16>, vector<8x8x32xf32> -> vector<8x8x32xf32>
    "tpu.trace_stop"() : () -> ()
    %47 = vector.shape_cast %46 : vector<8x8x32xf32> to vector<2x4x8x32xf32>
    %cst_40 = arith.constant dense<0.000000e+00> : vector<2x8x32xf32>
    %48 = vector.multi_reduction <add>, %47, %cst_40 [1] : vector<2x4x8x32xf32> to vector<2x8x32xf32>
    %49 = vector.shape_cast %4 : vector<1x32xf32> to vector<1x1x32xf32>
    %50 = vector.broadcast %49 : vector<1x1x32xf32> to vector<2x8x32xf32>
    %51 = arith.addf %48, %50 : vector<2x8x32xf32>
    %52 = arith.addf %0, %51 : vector<2x8x32xf32>
    %c0_41 = arith.constant 0 : index
    %c0_42 = arith.constant 0 : index
    %53 = vector.load %arg14[%c0_41, %c0_42] : memref<1x32xf32, #tpu.memory_space<vmem>>, vector<1x32xf32>
    %c0_43 = arith.constant 0 : index
    %c0_44 = arith.constant 0 : index
    %54 = vector.load %arg15[%c0_43, %c0_44] : memref<1x32xf32, #tpu.memory_space<vmem>>, vector<1x32xf32>
    %cst_45 = arith.constant dense<0.000000e+00> : vector<2x8xf32>
    %55 = vector.multi_reduction <add>, %52, %cst_45 [2] : vector<2x8x32xf32> to vector<2x8xf32>
    %56 = vector.shape_cast %55 : vector<2x8xf32> to vector<2x8x1xf32>
    %cst_46 = arith.constant 3.200000e+01 : f32
    %57 = vector.broadcast %cst_46 : f32 to vector<2x8x1xf32>
    %58 = arith.divf %56, %57 : vector<2x8x1xf32>
    %59 = vector.broadcast %58 : vector<2x8x1xf32> to vector<2x8x32xf32>
    %60 = arith.subf %52, %59 : vector<2x8x32xf32>
    %61 = arith.mulf %60, %60 : vector<2x8x32xf32>
    %cst_47 = arith.constant dense<0.000000e+00> : vector<2x8xf32>
    %62 = vector.multi_reduction <add>, %61, %cst_47 [2] : vector<2x8x32xf32> to vector<2x8xf32>
    %63 = vector.shape_cast %62 : vector<2x8xf32> to vector<2x8x1xf32>
    %cst_48 = arith.constant 3.200000e+01 : f32
    %64 = vector.broadcast %cst_48 : f32 to vector<2x8x1xf32>
    %65 = arith.divf %63, %64 : vector<2x8x1xf32>
    %66 = vector.broadcast %58 : vector<2x8x1xf32> to vector<2x8x32xf32>
    %67 = arith.subf %52, %66 : vector<2x8x32xf32>
    %cst_49 = arith.constant 9.99999974E-6 : f32
    %68 = vector.broadcast %cst_49 : f32 to vector<2x8x1xf32>
    %69 = arith.addf %65, %68 : vector<2x8x1xf32>
    %70 = math.rsqrt %69 : vector<2x8x1xf32>
    %71 = vector.broadcast %70 : vector<2x8x1xf32> to vector<2x8x32xf32>
    %72 = arith.mulf %67, %71 : vector<2x8x32xf32>
    %73 = vector.shape_cast %53 : vector<1x32xf32> to vector<1x1x32xf32>
    %74 = vector.broadcast %73 : vector<1x1x32xf32> to vector<2x8x32xf32>
    %75 = arith.mulf %72, %74 : vector<2x8x32xf32>
    %76 = vector.shape_cast %54 : vector<1x32xf32> to vector<1x1x32xf32>
    %77 = vector.broadcast %76 : vector<1x1x32xf32> to vector<2x8x32xf32>
    %78 = arith.addf %75, %77 : vector<2x8x32xf32>
    %c0_50 = arith.constant 0 : index
    %c0_51 = arith.constant 0 : index
    %79 = vector.load %arg10[%c0_50, %c0_51] : memref<32x64xbf16, #tpu.memory_space<vmem>>, vector<32x64xbf16>
    %80 = vector.shape_cast %79 : vector<32x64xbf16> to vector<1x32x64xbf16>
    %81 = vector.shape_cast %80 : vector<1x32x64xbf16> to vector<1x32x64xbf16>
    %82 = vector.broadcast %81 : vector<1x32x64xbf16> to vector<2x32x64xbf16>
    %c0_52 = arith.constant 0 : index
    %c0_53 = arith.constant 0 : index
    %83 = vector.load %arg12[%c0_52, %c0_53] : memref<64x32xbf16, #tpu.memory_space<vmem>>, vector<64x32xbf16>
    %84 = vector.shape_cast %83 : vector<64x32xbf16> to vector<1x64x32xbf16>
    %85 = vector.shape_cast %84 : vector<1x64x32xbf16> to vector<1x64x32xbf16>
    %86 = vector.broadcast %85 : vector<1x64x32xbf16> to vector<2x64x32xbf16>
    %87 = arith.truncf %78 : vector<2x8x32xf32> to vector<2x8x32xbf16>
    "tpu.trace_start"() <{level = 10 : i32, message = "bsd,bdf->bsf"}> : () -> ()
    %cst_54 = arith.constant dense<0.000000e+00> : vector<2x8x64xf32>
    %88 = tpu.matmul %87, %82, %cst_54 {dimension_numbers = #tpu.dot_dimension_numbers<[2], [1], [1], [2], [0, 0, 0, 1, 1, 2], [0], [0]>} : vector<2x8x32xbf16>, vector<2x32x64xbf16>, vector<2x8x64xf32> -> vector<2x8x64xf32>
    "tpu.trace_stop"() : () -> ()
    %89 = vector.shape_cast %5 : vector<1x64xf32> to vector<1x1x64xf32>
    %90 = vector.broadcast %89 : vector<1x1x64xf32> to vector<2x8x64xf32>
    %91 = arith.addf %88, %90 : vector<2x8x64xf32>
    %cst_55 = arith.constant 0.000000e+00 : f32
    %92 = vector.broadcast %cst_55 : f32 to vector<2x8x64xf32>
    %93 = arith.maximumf %91, %92 : vector<2x8x64xf32>
    %94 = arith.truncf %93 : vector<2x8x64xf32> to vector<2x8x64xbf16>
    "tpu.trace_start"() <{level = 10 : i32, message = "bsf,bfd->bsd"}> : () -> ()
    %cst_56 = arith.constant dense<0.000000e+00> : vector<2x8x32xf32>
    %95 = tpu.matmul %94, %86, %cst_56 {dimension_numbers = #tpu.dot_dimension_numbers<[2], [1], [1], [2], [0, 0, 0, 1, 1, 2], [0], [0]>} : vector<2x8x64xbf16>, vector<2x64x32xbf16>, vector<2x8x32xf32> -> vector<2x8x32xf32>
    "tpu.trace_stop"() : () -> ()
    %96 = vector.shape_cast %6 : vector<1x32xf32> to vector<1x1x32xf32>
    %97 = vector.broadcast %96 : vector<1x1x32xf32> to vector<2x8x32xf32>
    %98 = arith.addf %95, %97 : vector<2x8x32xf32>
    %99 = arith.addf %78, %98 : vector<2x8x32xf32>
    %c0_57 = arith.constant 0 : index
    %c0_58 = arith.constant 0 : index
    %100 = vector.load %arg16[%c0_57, %c0_58] : memref<1x32xf32, #tpu.memory_space<vmem>>, vector<1x32xf32>
    %c0_59 = arith.constant 0 : index
    %c0_60 = arith.constant 0 : index
    %101 = vector.load %arg17[%c0_59, %c0_60] : memref<1x32xf32, #tpu.memory_space<vmem>>, vector<1x32xf32>
    %cst_61 = arith.constant dense<0.000000e+00> : vector<2x8xf32>
    %102 = vector.multi_reduction <add>, %99, %cst_61 [2] : vector<2x8x32xf32> to vector<2x8xf32>
    %103 = vector.shape_cast %102 : vector<2x8xf32> to vector<2x8x1xf32>
    %cst_62 = arith.constant 3.200000e+01 : f32
    %104 = vector.broadcast %cst_62 : f32 to vector<2x8x1xf32>
    %105 = arith.divf %103, %104 : vector<2x8x1xf32>
    %106 = vector.broadcast %105 : vector<2x8x1xf32> to vector<2x8x32xf32>
    %107 = arith.subf %99, %106 : vector<2x8x32xf32>
    %108 = arith.mulf %107, %107 : vector<2x8x32xf32>
    %cst_63 = arith.constant dense<0.000000e+00> : vector<2x8xf32>
    %109 = vector.multi_reduction <add>, %108, %cst_63 [2] : vector<2x8x32xf32> to vector<2x8xf32>
    %110 = vector.shape_cast %109 : vector<2x8xf32> to vector<2x8x1xf32>
    %cst_64 = arith.constant 3.200000e+01 : f32
    %111 = vector.broadcast %cst_64 : f32 to vector<2x8x1xf32>
    %112 = arith.divf %110, %111 : vector<2x8x1xf32>
    %113 = vector.broadcast %105 : vector<2x8x1xf32> to vector<2x8x32xf32>
    %114 = arith.subf %99, %113 : vector<2x8x32xf32>
    %cst_65 = arith.constant 9.99999974E-6 : f32
    %115 = vector.broadcast %cst_65 : f32 to vector<2x8x1xf32>
    %116 = arith.addf %112, %115 : vector<2x8x1xf32>
    %117 = math.rsqrt %116 : vector<2x8x1xf32>
    %118 = vector.broadcast %117 : vector<2x8x1xf32> to vector<2x8x32xf32>
    %119 = arith.mulf %114, %118 : vector<2x8x32xf32>
    %120 = vector.shape_cast %100 : vector<1x32xf32> to vector<1x1x32xf32>
    %121 = vector.broadcast %120 : vector<1x1x32xf32> to vector<2x8x32xf32>
    %122 = arith.mulf %119, %121 : vector<2x8x32xf32>
    %123 = vector.shape_cast %101 : vector<1x32xf32> to vector<1x1x32xf32>
    %124 = vector.broadcast %123 : vector<1x1x32xf32> to vector<2x8x32xf32>
    %125 = arith.addf %122, %124 : vector<2x8x32xf32>
    %c0_66 = arith.constant 0 : index
    %c0_67 = arith.constant 0 : index
    %c0_68 = arith.constant 0 : index
    %126 = vector.load %arg18[%c0_66, %c0_67, %c0_68] : memref<2x8x32xf32, #tpu.memory_space<vmem>>, vector<2x8x32xf32>
    tpu.vector_store %arg18[%c0_66, %c0_67, %c0_68], %125 {strides = array<i32>} : memref<2x8x32xf32, #tpu.memory_space<vmem>>, vector<2x8x32xf32>,
    return
  }
}

</mosaic_0001>

<bundles_post_ra>
// kernel: encoder_layer.1
= control target key start
LH: loop header
LB: loop body
LE: loop exit
PB: predicated region body
PF: predicated region fallthrough
CT: control target
= control target key end

     0   :  { %s4814_s0 = inlined_call_operand.vmem [shape: f32[2,8,32], index: 0, kind: input, shape index: {}]   ;;  %s4815_s1 = inlined_call_operand.vmem [shape: f32[8,8,8], index: 1, kind: input, shape index: {}]   ;;  %s4816_s2 = inlined_call_operand.vmem [shape: bf16[8,32,8], index: 2, kind: input, shape index: {}]   ;;  %s4817_s3 = inlined_call_operand.vmem [shape: f32[8,1,8], index: 3, kind: input, shape index: {}]   ;;  %s4818_s4 = inlined_call_operand.vmem [shape: bf16[8,32,8], index: 4, kind: input, shape index: {}]   ;;  %s4819_s5 = inlined_call_operand.vmem [shape: f32[8,1,8], index: 5, kind: input, shape index: {}]   ;;  %s4820_s6 = inlined_call_operand.vmem [shape: bf16[8,32,8], index: 6, kind: input, shape index: {}]   ;;  %s4821_s7 = inlined_call_operand.vmem [shape: f32[8,1,8], index: 7, kind: input, shape index: {}]   ;;  %s4822_s8 = inlined_call_operand.vmem [shape: bf16[8,8,32], index: 8, kind: input, shape index: {}]   ;;  %s4823_s9 = inlined_call_operand.vmem [shape: f32[1,32], index: 9, kind: input, shape index: {}]   ;;  %s4824_s10 = inlined_call_operand.vmem [shape: bf16[32,64], index: 10, kind: input, shape index: {}]   ;;  %s4825_s11 = inlined_call_operand.vmem [shape: f32[1,64], index: 11, kind: input, shape index: {}]   ;;  %s4826_s12 = inlined_call_operand.vmem [shape: bf16[64,32], index: 12, kind: input, shape index: {}]   ;;  %s4827_s13 = inlined_call_operand.vmem [shape: f32[1,32], index: 13, kind: input, shape index: {}]   ;;  %s4828_s14 = inlined_call_operand.vmem [shape: f32[1,32], index: 14, kind: input, shape index: {}]   ;;  %s4829_s15 = inlined_call_operand.vmem [shape: f32[1,32], index: 15, kind: input, shape index: {}]   ;;  %s4830_s16 = inlined_call_operand.vmem [shape: f32[1,32], index: 16, kind: input, shape index: {}]   ;;  %s4831_s17 = inlined_call_operand.vmem [shape: f32[1,32], index: 17, kind: input, shape index: {}]   ;;  %s4832_s18 = inlined_call_operand.hbm [shape: f32[2,8,32], index: 18, kind: output, shape index: {}]  }
   0x1   :  { %4836 = sst [smem:[#allocation5_spill]] %s4814_s0 }
   0x2   :  { %4837 = sst [smem:[#allocation6_spill]] %s4815_s1 }
   0x3   :  { %4838 = sst [smem:[#allocation7_spill]] %s4816_s2 }
   0x4   :  { %s4839_s29 = sld [smem:[#allocation7_spill]]  ;;  %v3999_v1 = vmov 0.0   ;;  %vm4000_vm0 = vmmov 0   ;;  %s4840_s23 = sld [smem:[#allocation5_spill]]  ;;  %vm192_vm1 = vcmask 261120   ;;  %v3895_v21 = vld [vmem:[%s4818_s4] sm:$0xff]  }
   0x5   :  { %3498 = vmatprep.subr.bf16.mxu0 %v3999_v1  ;;  %3506 = vmatprep.subr.bf16.mxu1 %v3999_v1  ;;  %v3896_v22 = vld [vmem:[%s4818_s4 + $0x10] sm:$0xff]   ;;  %v3897_v23 = vld [vmem:[%s4818_s4 + $0x8] sm:$0xff]   ;;  %v3898_v24 = vld [vmem:[%s4818_s4 + $0x18] sm:$0xff]  }
   0x6   :  { %3502 = vmatprep.mubr.msk.bf16.mxu0 %vm4000_vm0, %v3999_v1  ;;  %3510 = vmatprep.mubr.msk.bf16.mxu1 %vm4000_vm0, %v3999_v1  ;;  %v3899_v25 = vld [vmem:[%s4818_s4 + $0x20] sm:$0xff]   ;;  %v3900_v26 = vld [vmem:[%s4818_s4 + $0x30] sm:$0xff]   ;;  %v3901_v27 = vld [vmem:[%s4818_s4 + $0x28] sm:$0xff]  }
   0x7   :  { %v3902_v28 = vld [vmem:[%s4818_s4 + $0x38] sm:$0xff]   ;;  %v3903_v29 = vld [vmem:[%s4818_s4 + $0x40] sm:$0xff]   ;;  %v3904_v30 = vld [vmem:[%s4818_s4 + $0x50] sm:$0xff]  }
   0xa   :  { %v3879_v0 = vld [vmem:[%s4839_s29] sm:$0xff]   ;;  %v3880_v2 = vld [vmem:[%s4839_s29 + $0x10] sm:$0xff]   ;;  %v3881_v3 = vld [vmem:[%s4839_s29 + $0x8] sm:$0xff]  }
   0xb   :  { %3499 = vmatpush3.bf16.msra.mxu0 %v3879_v0  ;;  %3507 = vmatpush3.bf16.msra.mxu1 %v3880_v2  ;;  %v3882_v4 = vld [vmem:[%s4839_s29 + $0x18] sm:$0xff]   ;;  %v61_v5 = vld [vmem:[%s4840_s23] sm:$0xff]  ;;  %v3884_v8 = vld [vmem:[%s4839_s29 + $0x30] sm:$0xff]  }
   0xc   :  { %3500 = vmatprep.subr.bf16.mxu0 %v3999_v1  ;;  %3508 = vmatprep.subr.bf16.mxu1 %v3999_v1  ;;  %v4122_v6 = vpack.c.bf16 %v61_v5, %v61_v5  ;;  %v3883_v7 = vld [vmem:[%s4839_s29 + $0x20] sm:$0xff]   ;;  %v3885_v9 = vld [vmem:[%s4839_s29 + $0x28] sm:$0xff]   ;;  %v3886_v10 = vld [vmem:[%s4839_s29 + $0x38] sm:$0xff]  }
   0xd   :  { %v3887_v11 = vld [vmem:[%s4839_s29 + $0x40] sm:$0xff]   ;;  %v3888_v12 = vld [vmem:[%s4839_s29 + $0x50] sm:$0xff]   ;;  %v3889_v13 = vld [vmem:[%s4839_s29 + $0x48] sm:$0xff]  }
   0xe   :  { %v62_v14 = vld [vmem:[%s4840_s23 + $0x8] sm:$0xff]  ;;  %v3890_v15 = vld [vmem:[%s4839_s29 + $0x58] sm:$0xff]   ;;  %v3891_v17 = vld [vmem:[%s4839_s29 + $0x60] sm:$0xff]  }
   0xf   :  { %3501 = vmatpush3.bf16.msra.mxu0 %v3881_v3  ;;  %3509 = vmatpush3.bf16.msra.mxu1 %v3882_v4  ;;  %v4175_v16 = vpack.c.bf16 %v62_v14, %v62_v14  ;;  %v3892_v18 = vld [vmem:[%s4839_s29 + $0x70] sm:$0xff]   ;;  %v3893_v19 = vld [vmem:[%s4839_s29 + $0x68] sm:$0xff]   ;;  %v3894_v20 = vld [vmem:[%s4839_s29 + $0x78] sm:$0xff]  }
  0x10   :  { %3514 = vmatprep.subr.bf16.mxu0 %v3999_v1  ;;  %3522 = vmatprep.subr.bf16.mxu1 %v3999_v1 }
  0x12   :  { %3503 = vmatmul.mubr.msk.bf16.vlgmr.msra.gmra.mrb[0].mxu0 %vm192_vm1, %v4122_v6  ;;  %3511 = vmatmul.mubr.msk.bf16.vlgmr.msra.gmra.mrb[0].mxu1 %vm192_vm1, %v4122_v6 }
  0x13   :  { %3515 = vmatpush3.bf16.msra.mxu0 %v3883_v7  ;;  %3523 = vmatpush3.bf16.msra.mxu1 %v3884_v8 }
  0x14   :  { %3516 = vmatprep.subr.bf16.mxu0 %v3999_v1  ;;  %3524 = vmatprep.subr.bf16.mxu1 %v3999_v1 }
  0x15   :  { %3518 = vmatprep.mubr.msk.bf16.mxu0 %vm4000_vm0, %v3999_v1  ;;  %3526 = vmatprep.mubr.msk.bf16.mxu1 %vm4000_vm0, %v3999_v1 }
  0x17   :  { %3517 = vmatpush3.bf16.msra.mxu0 %v3885_v9  ;;  %3525 = vmatpush3.bf16.msra.mxu1 %v3886_v10 }
  0x18   :  { %3530 = vmatprep.subr.bf16.mxu0 %v3999_v1  ;;  %3538 = vmatprep.subr.bf16.mxu1 %v3999_v1 }
  0x1a   :  { %3519 = vmatmul.mubr.msk.bf16.vlgmr.msra.gmra.mrb[4].mxu0 %vm192_vm1, %v4122_v6  ;;  %3527 = vmatmul.mubr.msk.bf16.vlgmr.msra.gmra.mrb[4].mxu1 %vm192_vm1, %v4122_v6 }
  0x1b   :  { %3531 = vmatpush3.bf16.msra.mxu0 %v3887_v11  ;;  %3539 = vmatpush3.bf16.msra.mxu1 %v3888_v12 }
  0x1c   :  { %3532 = vmatprep.subr.bf16.mxu0 %v3999_v1  ;;  %3540 = vmatprep.subr.bf16.mxu1 %v3999_v1 }
  0x1d   :  { %3534 = vmatprep.mubr.msk.bf16.mxu0 %vm4000_vm0, %v3999_v1  ;;  %3542 = vmatprep.mubr.msk.bf16.mxu1 %vm4000_vm0, %v3999_v1 }
  0x1f   :  { %3533 = vmatpush3.bf16.msra.mxu0 %v3889_v13  ;;  %3541 = vmatpush3.bf16.msra.mxu1 %v3890_v15 }
  0x20   :  { %3546 = vmatprep.subr.bf16.mxu0 %v3999_v1  ;;  %3554 = vmatprep.subr.bf16.mxu1 %v3999_v1 }
  0x22   :  { %3535 = vmatmul.mubr.msk.bf16.vlgmr.msra.gmra.mrb[8].mxu0 %vm192_vm1, %v4175_v16  ;;  %3543 = vmatmul.mubr.msk.bf16.vlgmr.msra.gmra.mrb[8].mxu1 %vm192_vm1, %v4175_v16 }
  0x23   :  { %3547 = vmatpush3.bf16.msra.mxu0 %v3891_v17  ;;  %3555 = vmatpush3.bf16.msra.mxu1 %v3892_v18 }
  0x24   :  { %3548 = vmatprep.subr.bf16.mxu0 %v3999_v1  ;;  %3556 = vmatprep.subr.bf16.mxu1 %v3999_v1 }
  0x25   :  { %3550 = vmatprep.mubr.msk.bf16.mxu0 %vm4000_vm0, %v3999_v1  ;;  %3558 = vmatprep.mubr.msk.bf16.mxu1 %vm4000_vm0, %v3999_v1 }
  0x27   :  { %3549 = vmatpush3.bf16.msra.mxu0 %v3893_v19  ;;  %3557 = vmatpush3.bf16.msra.mxu1 %v3894_v20 }
  0x28   :  { %3562 = vmatprep.subr.bf16.mxu0 %v3999_v1  ;;  %3570 = vmatprep.subr.bf16.mxu1 %v3999_v1 }
  0x2a   :  { %3551 = vmatmul.mubr.msk.bf16.vlgmr.msra.gmra.mrb[12].mxu0 %vm192_vm1, %v4175_v16  ;;  %3559 = vmatmul.mubr.msk.bf16.vlgmr.msra.gmra.mrb[12].mxu1 %vm192_vm1, %v4175_v16 }
  0x2b   :  { %3563 = vmatpush3.bf16.msra.mxu0 %v3895_v21  ;;  %3571 = vmatpush3.bf16.msra.mxu1 %v3896_v22 }
  0x2c   :  { %3564 = vmatprep.subr.bf16.mxu0 %v3999_v1  ;;  %3572 = vmatprep.subr.bf16.mxu1 %v3999_v1 }
  0x2d   :  { %3566 = vmatprep.mubr.msk.bf16.mxu0 %vm4000_vm0, %v3999_v1  ;;  %3574 = vmatprep.mubr.msk.bf16.mxu1 %vm4000_vm0, %v3999_v1 }
  0x2f   :  { %3565 = vmatpush3.bf16.msra.mxu0 %v3897_v23  ;;  %3573 = vmatpush3.bf16.msra.mxu1 %v3898_v24 }
  0x30   :  { %3578 = vmatprep.subr.bf16.mxu0 %v3999_v1  ;;  %3586 = vmatprep.subr.bf16.mxu1 %v3999_v1 }
  0x32   :  { %3567 = vmatmul.mubr.msk.bf16.vlgmr.msra.gmra.mrb[16].mxu0 %vm192_vm1, %v4122_v6  ;;  %3575 = vmatmul.mubr.msk.bf16.vlgmr.msra.gmra.mrb[16].mxu1 %vm192_vm1, %v4122_v6 }
  0x33   :  { %3579 = vmatpush3.bf16.msra.mxu0 %v3899_v25  ;;  %3587 = vmatpush3.bf16.msra.mxu1 %v3900_v26 }
  0x34   :  { %3580 = vmatprep.subr.bf16.mxu0 %v3999_v1  ;;  %3588 = vmatprep.subr.bf16.mxu1 %v3999_v1 }
  0x35   :  { %3582 = vmatprep.mubr.msk.bf16.mxu0 %vm4000_vm0, %v3999_v1  ;;  %3590 = vmatprep.mubr.msk.bf16.mxu1 %vm4000_vm0, %v3999_v1 }
  0x37   :  { %3581 = vmatpush3.bf16.msra.mxu0 %v3901_v27  ;;  %3589 = vmatpush3.bf16.msra.mxu1 %v3902_v28 }
  0x38   :  { %3594 = vmatprep.subr.bf16.mxu0 %v3999_v1  ;;  %3602 = vmatprep.subr.bf16.mxu1 %v3999_v1 }
  0x39   :  { %23 = vsyncpa [#allocation3], 0  ;;  %v3905_v31 = vld [vmem:[%s4818_s4 + $0x48] sm:$0xff]   ;;  %v3906_v32 = vld [vmem:[%s4818_s4 + $0x58] sm:$0xff]   ;;  %vm1611_vm2 = vcmask 64512   ;;  %vm2103_vm3 = vcmask 1043456  }
  0x3a   :  { %3583 = vmatmul.mubr.msk.bf16.vlgmr.msra.gmra.mrb[20].mxu0 %vm192_vm1, %v4122_v6  ;;  %3591 = vmatmul.mubr.msk.bf16.vlgmr.msra.gmra.mrb[20].mxu1 %vm192_vm1, %v4122_v6  ;;  %v3907_v33 = vld [vmem:[%s4818_s4 + $0x60] sm:$0xff]   ;;  %v3908_v34 = vld [vmem:[%s4818_s4 + $0x70] sm:$0xff]   ;;  %v3909_v35 = vld [vmem:[%s4818_s4 + $0x68] sm:$0xff]   ;;  %s4841_s19 = sld [smem:[#allocation6_spill]]  ;;  %vm3074_vm4 = vcmask 523264   ;;  %s4001_s25 = smov [#allocation2]  }
  0x3b   :  { %3595 = vmatpush3.bf16.msra.mxu0 %v3903_v29  ;;  %3603 = vmatpush3.bf16.msra.mxu1 %v3904_v30  ;;  %v3910_v36 = vld [vmem:[%s4818_s4 + $0x78] sm:$0xff]   ;;  %v3911_v37 = vld [vmem:[%s4820_s6] sm:$0xff]   ;;  %v3912_v38 = vld [vmem:[%s4820_s6 + $0x10] sm:$0xff]  }
  0x3c   :  { %3596 = vmatprep.subr.bf16.mxu0 %v3999_v1  ;;  %3604 = vmatprep.subr.bf16.mxu1 %v3999_v1  ;;  %v3913_v39 = vld [vmem:[%s4820_s6 + $0x8] sm:$0xff]   ;;  %v3914_v40 = vld [vmem:[%s4820_s6 + $0x18] sm:$0xff]   ;;  %v3915_v41 = vld [vmem:[%s4820_s6 + $0x20] sm:$0xff]  }
  0x3d   :  { %3598 = vmatprep.mubr.msk.bf16.mxu0 %vm4000_vm0, %v3999_v1  ;;  %3606 = vmatprep.mubr.msk.bf16.mxu1 %vm4000_vm0, %v3999_v1  ;;  %v3916_v42 = vld [vmem:[%s4820_s6 + $0x30] sm:$0xff]   ;;  %v3917_v43 = vld [vmem:[%s4820_s6 + $0x28] sm:$0xff]   ;;  %v3918_v44 = vld [vmem:[%s4820_s6 + $0x38] sm:$0xff]  }
  0x3e   :  { %v3919_v45 = vld [vmem:[%s4820_s6 + $0x40] sm:$0xff]   ;;  %v3920_v46 = vld [vmem:[%s4820_s6 + $0x50] sm:$0xff]   ;;  %v3921_v47 = vld [vmem:[%s4820_s6 + $0x48] sm:$0xff]  }
  0x3f   :  { %3597 = vmatpush3.bf16.msra.mxu0 %v3905_v31  ;;  %3605 = vmatpush3.bf16.msra.mxu1 %v3906_v32  ;;  %v3922_v48 = vld [vmem:[%s4820_s6 + $0x58] sm:$0xff]   ;;  %v3923_v49 = vld [vmem:[%s4820_s6 + $0x60] sm:$0xff]   ;;  %v3924_v50 = vld [vmem:[%s4820_s6 + $0x70] sm:$0xff]  }
  0x40   :  { %3610 = vmatprep.subr.bf16.mxu0 %v3999_v1  ;;  %3618 = vmatprep.subr.bf16.mxu1 %v3999_v1  ;;  %v3925_v51 = vld [vmem:[%s4820_s6 + $0x68] sm:$0xff]   ;;  %v3926_v52 = vld [vmem:[%s4820_s6 + $0x78] sm:$0xff]   ;;  %v3257_v22 = vld [vmem:[%s4819_s5] ss:$0 sm:$0xff] }
  0x41   :  { %v3258_v23 = vld [vmem:[%s4819_s5 + $0x1] ss:$0 sm:$0xff] }
  0x42   :  { %3599 = vmatmul.mubr.msk.bf16.vlgmr.msra.gmra.mrb[24].mxu0 %vm192_vm1, %v4175_v16  ;;  %3607 = vmatmul.mubr.msk.bf16.vlgmr.msra.gmra.mrb[24].mxu1 %vm192_vm1, %v4175_v16 }
  0x43   :  { %3611 = vmatpush3.bf16.msra.mxu0 %v3907_v33  ;;  %3619 = vmatpush3.bf16.msra.mxu1 %v3908_v34  ;;  %v3225_v34 = vld [vmem:[%s4817_s3] ss:$0 sm:$0xff] }
  0x44   :  { %3612 = vmatprep.subr.bf16.mxu0 %v3999_v1  ;;  %3620 = vmatprep.subr.bf16.mxu1 %v3999_v1 }
  0x45   :  { %3614 = vmatprep.mubr.msk.bf16.mxu0 %vm4000_vm0, %v3999_v1  ;;  %3622 = vmatprep.mubr.msk.bf16.mxu1 %vm4000_vm0, %v3999_v1 }
  0x47   :  { %3613 = vmatpush3.bf16.msra.mxu0 %v3909_v35  ;;  %3621 = vmatpush3.bf16.msra.mxu1 %v3910_v36 }
  0x48   :  { %3626 = vmatprep.subr.bf16.mxu0 %v3999_v1  ;;  %3634 = vmatprep.subr.bf16.mxu1 %v3999_v1 }
  0x4a   :  { %3615 = vmatmul.mubr.msk.bf16.vlgmr.msra.gmra.mrb[28].mxu0 %vm192_vm1, %v4175_v16  ;;  %3623 = vmatmul.mubr.msk.bf16.vlgmr.msra.gmra.mrb[28].mxu1 %vm192_vm1, %v4175_v16 }
  0x4b   :  { %3627 = vmatpush3.bf16.msra.mxu0 %v3911_v37  ;;  %3630 = vmatprep.mubr.msk.bf16.mxu0 %vm4000_vm0, %v3999_v1  ;;  %v3226_v37 = vld [vmem:[%s4817_s3 + $0x1] ss:$0 sm:$0xff] }
  0x4c   :  { %3628 = vmatprep.subr.bf16.mxu0 %v3999_v1  ;;  %3638 = vmatprep.mubr.msk.bf16.mxu1 %vm4000_vm0, %v3999_v1 }
  0x4d   :  { %3635 = vmatpush3.bf16.msra.mxu1 %v3912_v38 }
  0x4e   :  { %3636 = vmatprep.subr.bf16.mxu1 %v3999_v1 }
  0x4f   :  { %3629 = vmatpush3.bf16.msra.mxu0 %v3913_v39 }
  0x50   :  { %3642 = vmatprep.subr.bf16.mxu0 %v3999_v1 }
  0x51   :  { %3637 = vmatpush3.bf16.msra.mxu1 %v3914_v40  ;;  %v3259_v40 = vld [vmem:[%s4819_s5 + $0x2] ss:$0 sm:$0xff] }
  0x52   :  { %3631 = vmatmul.mubr.msk.bf16.vlgmr.msra.gmra.mrb[32].mxu0 %vm192_vm1, %v4122_v6  ;;  %3650 = vmatprep.subr.bf16.mxu1 %v3999_v1 }
  0x53   :  { %3643 = vmatpush3.bf16.msra.mxu0 %v3915_v41  ;;  %3646 = vmatprep.mubr.msk.bf16.mxu0 %vm4000_vm0, %v3999_v1 }
  0x54   :  { %3639 = vmatmul.mubr.msk.bf16.vlgmr.msra.gmra.mrb[32].mxu1 %vm192_vm1, %v4122_v6  ;;  %3644 = vmatprep.subr.bf16.mxu0 %v3999_v1 }
  0x55   :  { %3651 = vmatpush3.bf16.msra.mxu1 %v3916_v42  ;;  %3654 = vmatprep.mubr.msk.bf16.mxu1 %vm4000_vm0, %v3999_v1  ;;  %v3260_v42 = vld [vmem:[%s4819_s5 + $0x3] ss:$0 sm:$0xff] }
  0x56   :  { %3652 = vmatprep.subr.bf16.mxu1 %v3999_v1 }
  0x57   :  { %3645 = vmatpush3.bf16.msra.mxu0 %v3917_v43 }
  0x58   :  { %3658 = vmatprep.subr.bf16.mxu0 %v3999_v1 }
  0x59   :  { %3653 = vmatpush3.bf16.msra.mxu1 %v3918_v44 }
  0x5a   :  { %3647 = vmatmul.mubr.msk.bf16.vlgmr.msra.gmra.mrb[36].mxu0 %vm192_vm1, %v4122_v6  ;;  %3666 = vmatprep.subr.bf16.mxu1 %v3999_v1 }
  0x5b   :  { %3659 = vmatpush3.bf16.msra.mxu0 %v3919_v45  ;;  %3662 = vmatprep.mubr.msk.bf16.mxu0 %vm4000_vm0, %v3999_v1 }
  0x5c   :  { %3655 = vmatmul.mubr.msk.bf16.vlgmr.msra.gmra.mrb[36].mxu1 %vm192_vm1, %v4122_v6  ;;  %3660 = vmatprep.subr.bf16.mxu0 %v3999_v1 }
  0x5d   :  { %3667 = vmatpush3.bf16.msra.mxu1 %v3920_v46  ;;  %3670 = vmatprep.mubr.msk.bf16.mxu1 %vm4000_vm0, %v3999_v1 }
  0x5e   :  { %3668 = vmatprep.subr.bf16.mxu1 %v3999_v1 }
  0x5f   :  { %3661 = vmatpush3.bf16.msra.mxu0 %v3921_v47 }
  0x60   :  { %3674 = vmatprep.subr.bf16.mxu0 %v3999_v1 }
  0x61   :  { %3669 = vmatpush3.bf16.msra.mxu1 %v3922_v48 }
  0x62   :  { %3663 = vmatmul.mubr.msk.bf16.vlgmr.msra.gmra.mrb[40].mxu0 %vm192_vm1, %v4175_v16  ;;  %3682 = vmatprep.subr.bf16.mxu1 %v3999_v1 }
  0x63   :  { %3678 = vmatprep.mubr.msk.bf16.mxu0 %vm4000_vm0, %v3999_v1  ;;  %3675 = vmatpush3.bf16.msra.mxu0 %v3923_v49 }
  0x64   :  { %3671 = vmatmul.mubr.msk.bf16.vlgmr.msra.gmra.mrb[40].mxu1 %vm192_vm1, %v4175_v16  ;;  %3676 = vmatprep.subr.bf16.mxu0 %v3999_v1 }
  0x65   :  { %3683 = vmatpush3.bf16.msra.mxu1 %v3924_v50  ;;  %3686 = vmatprep.mubr.msk.bf16.mxu1 %vm4000_vm0, %v3999_v1 }
  0x66   :  { %3684 = vmatprep.subr.bf16.mxu1 %v3999_v1 }
  0x67   :  { %3677 = vmatpush3.bf16.msra.mxu0 %v3925_v51 }
  0x68   :  { %3690 = vmatprep.subr.bf16.mxu0 %v3999_v1 }
  0x69   :  { %3685 = vmatpush3.bf16.msra.mxu1 %v3926_v52 }
  0x6a   :  { %3696 = vmatprep.subr.bf16.mxu1 %v3999_v1  ;;  %3679 = vmatmul.mubr.msk.bf16.vlgmr.msra.gmra.mrb[44].mxu0 %vm192_vm1, %v4175_v16 }
  0x6b   :  { %3692 = vmatprep.mubr.msk.bf16.mxu0 %vm4000_vm0, %v3999_v1 }
  0x6c   :  { %3687 = vmatmul.mubr.msk.bf16.vlgmr.msra.gmra.mrb[44].mxu1 %vm192_vm1, %v4175_v16 }
  0x6d   :  { %3698 = vmatprep.mubr.msk.bf16.mxu1 %vm4000_vm0, %v3999_v1 }
  0xe5   :  { %v230_v53 = vpop.f32.mrb[0].mxu0  ;;  %v282_v55 = vpop.f32.mrb[0].mxu1 }
  0xe6   :  { %v3504_v54 = vpop.f32.mrb[1].mxu0  ;;  %v3512_v57 = vpop.f32.mrb[1].mxu1  ;;  %v231_v41 = vadd.f32 %v3225_v34, %v230_v53  ;;  %v283_v43 = vadd.f32 %v3226_v37, %v282_v55 }
  0xe7   :  { %v233_v56 = vpop.f32.mrb[2].mxu0  ;;  %v285_v59 = vpop.f32.mrb[2].mxu1  ;;  %v3227_v57 = vld [vmem:[%s4817_s3 + $0x2] ss:$0 sm:$0xff] }
  0xe8   :  { %v3505_v58 = vpop.f32.mrb[3].mxu0  ;;  %v3513_v60 = vpop.f32.mrb[3].mxu1  ;;  %v1595_v51 = vpack.c.bf16 %v231_v41, %v231_v41  ;;  %v1596_v56 = vpack.c.bf16 %v283_v43, %v283_v43  ;;  %v3228_v59 = vld [vmem:[%s4817_s3 + $0x3] ss:$0 sm:$0xff] }
  0xed   :  { %v4403_v61 = vpop.f32.mrb[4].mxu0  ;;  %v4405_v63 = vpop.f32.mrb[4].mxu1 }
  0xee   :  { %v3520_v62 = vpop.f32.mrb[5].mxu0  ;;  %v3528_v2 = vpop.f32.mrb[5].mxu1 }
  0xef   :  { %v337_v0 = vpop.f32.mrb[6].mxu0  ;;  %v389_v4 = vpop.f32.mrb[6].mxu1  ;;  %v335_v2 = vadd.f32 %v3227_v57, %v4403_v61 }
  0xf0   :  { %v3521_v3 = vpop.f32.mrb[7].mxu0  ;;  %v3529_v5 = vpop.f32.mrb[7].mxu1  ;;  %v3261_v0 = vld [vmem:[%s4819_s5 + $0x4] ss:$0 sm:$0xff]  ;;  %v387_v4 = vadd.f32 %v3228_v59, %v4405_v63 }
  0xf1   :  { %v3262_v3 = vld [vmem:[%s4819_s5 + $0x5] ss:$0 sm:$0xff]  ;;  %v3229_v63 = vld [vmem:[%s4817_s3 + $0x4] ss:$0 sm:$0xff] }
  0xf5   :  { %v4407_v6 = vpop.f32.mrb[8].mxu0  ;;  %v4409_v8 = vpop.f32.mrb[8].mxu1 }
  0xf6   :  { %v3536_v7 = vpop.f32.mrb[9].mxu0  ;;  %v3544_v10 = vpop.f32.mrb[9].mxu1 }
  0xf7   :  { %v444_v9 = vpop.f32.mrb[10].mxu0  ;;  %v496_v12 = vpop.f32.mrb[10].mxu1 }
  0xf8   :  { %v3537_v11 = vpop.f32.mrb[11].mxu0  ;;  %v3545_v13 = vpop.f32.mrb[11].mxu1 }
  0xf9   :  { %v1597_v13 = vpack.c.bf16 %v335_v2, %v335_v2 }
  0xfd   :  { %v4411_v14 = vpop.f32.mrb[12].mxu0  ;;  %v4413_v16 = vpop.f32.mrb[12].mxu1 }
  0xfe   :  { %v3552_v15 = vpop.f32.mrb[13].mxu0  ;;  %v3560_v18 = vpop.f32.mrb[13].mxu1 }
  0xff   :  { %v548_v17 = vpop.f32.mrb[14].mxu0  ;;  %v600_v20 = vpop.f32.mrb[14].mxu1 }
 0x100   :  { %v3553_v19 = vpop.f32.mrb[15].mxu0  ;;  %v3561_v21 = vpop.f32.mrb[15].mxu1 }
 0x101   :  { %v1598_v19 = vpack.c.bf16 %v387_v4, %v387_v4 }
 0x105   :  { %v729_v24 = vpop.f32.mrb[16].mxu0  ;;  %v781_v26 = vpop.f32.mrb[16].mxu1 }
 0x106   :  { %v730_v25 = vadd.f32 %v3257_v22, %v729_v24  ;;  %v3568_v27 = vpop.f32.mrb[17].mxu0  ;;  %v782_v28 = vadd.f32 %v3258_v23, %v781_v26  ;;  %v3576_v30 = vpop.f32.mrb[17].mxu1  ;;  %v3230_v22 = vld [vmem:[%s4817_s3 + $0x5] ss:$0 sm:$0xff]  ;;  %v442_v26 = vadd.f32 %v3229_v63, %v4407_v6 }
 0x107   :  { %v732_v29 = vpop.f32.mrb[18].mxu0  ;;  %v784_v33 = vpop.f32.mrb[18].mxu1  ;;  %v3264_v27 = vld [vmem:[%s4819_s5 + $0x7] ss:$0 sm:$0xff] }
 0x108   :  { %v1603_v31 = vpack.c.bf16 %v730_v25, %v730_v25  ;;  %v3569_v32 = vpop.f32.mrb[19].mxu0  ;;  %v1604_v35 = vpack.c.bf16 %v782_v28, %v782_v28  ;;  %v3577_v36 = vpop.f32.mrb[19].mxu1  ;;  %v3263_v25 = vld [vmem:[%s4819_s5 + $0x6] ss:$0 sm:$0xff]  ;;  %v494_v28 = vadd.f32 %v3230_v22, %v4409_v8  ;;  %s3214_s5 = sshll.u32 %s4001_s25, 4  ;;  %s3215_s5 = int_to_ptr.vmem [resolvable:$true] %s3214_s5 }
 0x109   :  { %v3231_v8 = vld [vmem:[%s4817_s3 + $0x6] ss:$0 sm:$0xff]  ;;  %p3980_p1 = scmp.lt.s32.totalorder %s3215_s5, %s3215_s5 }
 0x10a   :  { %v1616_v38 = vsel %vm1611_vm2, %v1603_v31, 0  ;;  %v1662_v39 = vsel %vm1611_vm2, %v1604_v35, 0  ;;  %v1599_v35 = vpack.c.bf16 %v442_v26, %v442_v26 }
 0x10b   :  { %3691 = vmatpush3.bf16.xpose.msra.mxu0 %v1616_v38  ;;  %3697 = vmatpush3.bf16.xpose.msra.mxu1 %v1662_v39  ;;  %v1600_v39 = vpack.c.bf16 %v494_v28, %v494_v28 }
 0x10c   :  { %3702 = vmatprep.subr.bf16.mxu0 %v3999_v1  ;;  %3708 = vmatprep.subr.bf16.mxu1 %v3999_v1 }
 0x10d   :  { %v833_v44 = vpop.f32.mrb[20].mxu0  ;;  %v885_v46 = vpop.f32.mrb[20].mxu1 }
 0x10e   :  { %v834_v45 = vadd.f32 %v3259_v40, %v833_v44  ;;  %v3584_v47 = vpop.f32.mrb[21].mxu0  ;;  %v886_v48 = vadd.f32 %v3260_v42, %v885_v46  ;;  %v3592_v50 = vpop.f32.mrb[21].mxu1  ;;  %v3232_v42 = vld [vmem:[%s4817_s3 + $0x7] ss:$0 sm:$0xff] }
 0x10f   :  { %v836_v49 = vpop.f32.mrb[22].mxu0  ;;  %v888_v54 = vpop.f32.mrb[22].mxu1  ;;  %v598_v46 = vadd.f32 %v3232_v42, %v4413_v16  ;;  %v92_v42 = vld [vmem:[%s4841_s19 + $0x10] sm:$0xff] }
 0x110   :  { %v1605_v52 = vpack.c.bf16 %v834_v45, %v834_v45  ;;  %v3585_v53 = vpop.f32.mrb[23].mxu0  ;;  %v1606_v58 = vpack.c.bf16 %v886_v48, %v886_v48  ;;  %v3593_v55 = vpop.f32.mrb[23].mxu1  ;;  %v546_v45 = vadd.f32 %v3231_v8, %v4411_v14  ;;  %v3289_v14 = vld [vmem:[%s4821_s7] ss:$0 sm:$0xff]  ;;  %v3290_v49 = vld [vmem:[%s4821_s7 + $0x1] ss:$0 sm:$0xff] }
 0x111   :  { %v1602_v48 = vpack.c.bf16 %v598_v46, %v598_v46 }
 0x112   :  { %v1708_v60 = vsel %vm1611_vm2, %v1605_v52, 0  ;;  %3693 = vmatmul.mubr.msk.bf16.vlgmr.msra.gmra.mrb[48].mxu0 %vm1611_vm2, %v1595_v51  ;;  %v1754_v62 = vsel %vm1611_vm2, %v1606_v58, 0  ;;  %3699 = vmatmul.mubr.msk.bf16.vlgmr.msra.gmra.mrb[48].mxu1 %vm1611_vm2, %v1596_v56  ;;  %v1601_v47 = vpack.c.bf16 %v546_v45, %v546_v45 }
 0x113   :  { %3703 = vmatpush3.bf16.xpose.msra.mxu0 %v1708_v60  ;;  %3709 = vmatpush3.bf16.xpose.msra.mxu1 %v1754_v62 }
 0x114   :  { %3704 = vmatprep.mubr.msk.bf16.mxu0 %vm4000_vm0, %v3999_v1  ;;  %3710 = vmatprep.mubr.msk.bf16.mxu1 %vm4000_vm0, %v3999_v1 }
 0x115   :  { %v937_v5 = vpop.f32.mrb[24].mxu0  ;;  %3714 = vmatprep.subr.bf16.mxu0 %v3999_v1  ;;  %v989_v9 = vpop.f32.mrb[24].mxu1  ;;  %3720 = vmatprep.subr.bf16.mxu1 %v3999_v1 }
 0x116   :  { %v938_v7 = vadd.f32 %v3261_v0, %v937_v5  ;;  %v3600_v10 = vpop.f32.mrb[25].mxu0  ;;  %v990_v61 = vadd.f32 %v3262_v3, %v989_v9  ;;  %v3608_v12 = vpop.f32.mrb[25].mxu1 }
 0x117   :  { %v940_v11 = vpop.f32.mrb[26].mxu0  ;;  %v992_v18 = vpop.f32.mrb[26].mxu1 }
 0x118   :  { %v1607_v15 = vpack.c.bf16 %v938_v7, %v938_v7  ;;  %v3601_v17 = vpop.f32.mrb[27].mxu0  ;;  %v1608_v20 = vpack.c.bf16 %v990_v61, %v990_v61  ;;  %v3609_v21 = vpop.f32.mrb[27].mxu1 }
 0x11a   :  { %v1800_v23 = vsel %vm1611_vm2, %v1607_v15, 0  ;;  %3705 = vmatmul.mubr.msk.bf16.vlgmr.msra.gmra.mrb[52].mxu0 %vm1611_vm2, %v1597_v13  ;;  %v1846_v24 = vsel %vm1611_vm2, %v1608_v20, 0  ;;  %3711 = vmatmul.mubr.msk.bf16.vlgmr.msra.gmra.mrb[52].mxu1 %vm1611_vm2, %v1598_v19 }
 0x11b   :  { %3715 = vmatpush3.bf16.xpose.msra.mxu0 %v1800_v23  ;;  %3721 = vmatpush3.bf16.xpose.msra.mxu1 %v1846_v24 }
 0x11c   :  { %3716 = vmatprep.mubr.msk.bf16.mxu0 %vm4000_vm0, %v3999_v1  ;;  %3722 = vmatprep.mubr.msk.bf16.mxu1 %vm4000_vm0, %v3999_v1 }
 0x11d   :  { %v1041_v29 = vpop.f32.mrb[28].mxu0  ;;  %3726 = vmatprep.subr.bf16.mxu0 %v3999_v1  ;;  %v1093_v31 = vpop.f32.mrb[28].mxu1  ;;  %3732 = vmatprep.subr.bf16.mxu1 %v3999_v1 }
 0x11e   :  { %v1042_v30 = vadd.f32 %v3263_v25, %v1041_v29  ;;  %v3616_v32 = vpop.f32.mrb[29].mxu0  ;;  %v1094_v6 = vadd.f32 %v3264_v27, %v1093_v31  ;;  %v3624_v34 = vpop.f32.mrb[29].mxu1  ;;  %v90_v29 = vld [vmem:[%s4841_s19] sm:$0xff] }
 0x11f   :  { %v1044_v33 = vpop.f32.mrb[30].mxu0  ;;  %v1096_v38 = vpop.f32.mrb[30].mxu1 }
 0x120   :  { %v1609_v36 = vpack.c.bf16 %v1042_v30, %v1042_v30  ;;  %v3617_v37 = vpop.f32.mrb[31].mxu0  ;;  %v1610_v40 = vpack.c.bf16 %v1094_v6, %v1094_v6  ;;  %v3625_v41 = vpop.f32.mrb[31].mxu1 }
 0x122   :  { %v1892_v43 = vsel %vm1611_vm2, %v1609_v36, 0  ;;  %3717 = vmatmul.mubr.msk.bf16.vlgmr.msra.gmra.mrb[56].mxu0 %vm1611_vm2, %v1599_v35  ;;  %v1938_v44 = vsel %vm1611_vm2, %v1610_v40, 0  ;;  %3723 = vmatmul.mubr.msk.bf16.vlgmr.msra.gmra.mrb[56].mxu1 %vm1611_vm2, %v1600_v39  ;;  %v91_v35 = vld [vmem:[%s4841_s19 + $0x8] sm:$0xff] }
 0x123   :  { %3727 = vmatpush3.bf16.xpose.msra.mxu0 %v1892_v43  ;;  %3733 = vmatpush3.bf16.xpose.msra.mxu1 %v1938_v44 }
 0x124   :  { %3728 = vmatprep.mubr.msk.bf16.mxu0 %vm4000_vm0, %v3999_v1  ;;  %3734 = vmatprep.mubr.msk.bf16.mxu1 %vm4000_vm0, %v3999_v1 }
 0x125   :  { %3738 = vmatprep.subr.bf16.mxu0 %v3999_v1  ;;  %3744 = vmatprep.subr.bf16.mxu1 %v3999_v1  ;;  %v1225_v16 = vpop.f32.mrb[32].mxu0 }
 0x126   :  { %v1226_v50 = vadd.f32 %v3289_v14, %v1225_v16  ;;  %v3632_v51 = vpop.f32.mrb[33].mxu0  ;;  %v93_v16 = vld [vmem:[%s4841_s19 + $0x18] sm:$0xff] }
 0x127   :  { %v1228_v52 = vpop.f32.mrb[34].mxu0  ;;  %v1277_v53 = vpop.f32.mrb[32].mxu1 }
 0x128   :  { %v2092_v54 = vpack.c.bf16 %v1226_v50, %v1226_v50  ;;  %v3633_v56 = vpop.f32.mrb[35].mxu0  ;;  %v1278_v57 = vadd.f32 %v3290_v49, %v1277_v53  ;;  %v3640_v58 = vpop.f32.mrb[33].mxu1 }
 0x129   :  { %v1280_v55 = vpop.f32.mrb[34].mxu1 }
 0x12a   :  { %3729 = vmatmul.mubr.msk.bf16.vlgmr.msra.gmra.mrb[60].mxu0 %vm1611_vm2, %v1601_v47  ;;  %3735 = vmatmul.mubr.msk.bf16.vlgmr.msra.gmra.mrb[60].mxu1 %vm1611_vm2, %v1602_v48  ;;  %v2105_v59 = vsel %vm2103_vm3, %v2092_v54, 0  ;;  %v2093_v60 = vpack.c.bf16 %v1278_v57, %v1278_v57  ;;  %v3641_v62 = vpop.f32.mrb[35].mxu1  ;;  %v94_v57 = vld [vmem:[%s4841_s19 + $0x20] sm:$0xff] }
 0x12b   :  { %3740 = vmatprep.mubr.msk.bf16.mxu0 %vm4000_vm0, %v3999_v1  ;;  %3746 = vmatprep.mubr.msk.bf16.mxu1 %vm4000_vm0, %v3999_v1  ;;  %v95_v62 = vld [vmem:[%s4841_s19 + $0x28] sm:$0xff] }
 0x12c   :  { %3739 = vmatpush3.bf16.msra.mxu0 %v2105_v59  ;;  %v2151_v0 = vsel %vm2103_vm3, %v2093_v60, 0 }
 0x12d   :  { %3750 = vmatprep.subr.bf16.mxu0 %v3999_v1  ;;  %v4518_v2 = vpop.f32.mrb[36].mxu0  ;;  %3745 = vmatpush3.bf16.msra.mxu1 %v2151_v0 }
 0x12e   :  { %v3648_v3 = vpop.f32.mrb[37].mxu0  ;;  %3756 = vmatprep.subr.bf16.mxu1 %v3999_v1 }
 0x12f   :  { %v1332_v4 = vpop.f32.mrb[38].mxu0  ;;  %v4521_v5 = vpop.f32.mrb[36].mxu1 }
 0x130   :  { %v3649_v7 = vpop.f32.mrb[39].mxu0  ;;  %v3656_v9 = vpop.f32.mrb[37].mxu1 }
 0x131   :  { %v1384_v10 = vpop.f32.mrb[38].mxu1 }
 0x132   :  { %v3657_v61 = vpop.f32.mrb[39].mxu1 }
 0x135   :  { %v4523_v11 = vpop.f32.mrb[40].mxu0 }
 0x136   :  { %v3664_v12 = vpop.f32.mrb[41].mxu0 }
 0x137   :  { %v1436_v13 = vpop.f32.mrb[42].mxu0  ;;  %v4525_v15 = vpop.f32.mrb[40].mxu1 }
 0x138   :  { %v3665_v17 = vpop.f32.mrb[43].mxu0  ;;  %v3672_v18 = vpop.f32.mrb[41].mxu1 }
 0x139   :  { %v1488_v19 = vpop.f32.mrb[42].mxu1 }
 0x13a   :  { %v3673_v63 = vpop.f32.mrb[43].mxu1  ;;  %v96_v19 = vld [vmem:[%s4841_s19 + $0x30] sm:$0xff] }
 0x13d   :  { %v4527_v20 = vpop.f32.mrb[44].mxu0 }
 0x13e   :  { %v3680_v22 = vpop.f32.mrb[45].mxu0 }
 0x13f   :  { %v4529_v21 = vpop.f32.mrb[44].mxu1  ;;  %v1540_v24 = vpop.f32.mrb[46].mxu0 }
 0x140   :  { %v3688_v23 = vpop.f32.mrb[45].mxu1  ;;  %v3681_v26 = vpop.f32.mrb[47].mxu0  ;;  %v97_v24 = vld [vmem:[%s4841_s19 + $0x38] sm:$0xff] }
 0x141   :  { %v1592_v25 = vpop.f32.mrb[46].mxu1 }
 0x142   :  { %v3689_v27 = vpop.f32.mrb[47].mxu1 }
 0x1e5   :  { %v1652_v28 = vpop.f32.mrb[48].mxu0  ;;  %v1698_v31 = vpop.f32.mrb[48].mxu1 }
 0x1e6   :  { %v1980_v30 = vmul.f32 0.35355338, %v1652_v28  ;;  %v3694_v32 = vpop.f32.mrb[49].mxu0  ;;  %v1981_v6 = vmul.f32 0.35355338, %v1698_v31  ;;  %v3700_v33 = vpop.f32.mrb[49].mxu1 }
 0x1e7   :  { %v1655_v34 = vpop.f32.mrb[50].mxu0  ;;  %v1701_v36 = vpop.f32.mrb[50].mxu1 }
 0x1e8   :  { %v3695_v37 = vpop.f32.mrb[51].mxu0  ;;  %v4537_v38 = vadd.f32 %v1980_v30, %v90_v29  ;;  %v3701_v39 = vpop.f32.mrb[51].mxu1  ;;  %v4541_v40 = vadd.f32 %v1981_v6, %v91_v35 }
 0x1ea   :  { %v1996_v8 = vsel %vm1611_vm2, %v4537_v38, -inf  ;;  %v1999_v46 = vsel %vm1611_vm2, %v4541_v40, -inf }
 0x1eb   :  { %1997 = vmax.xlane.f32.xlu0 %v1996_v8 }
 0x1ed   :  { %v1744_v41 = vpop.f32.mrb[52].mxu0  ;;  %v1790_v44 = vpop.f32.mrb[52].mxu1 }
 0x1ee   :  { %v1982_v43 = vmul.f32 0.35355338, %v1744_v41  ;;  %v3706_v45 = vpop.f32.mrb[53].mxu0  ;;  %v1983_v47 = vmul.f32 0.35355338, %v1790_v44  ;;  %v3712_v48 = vpop.f32.mrb[53].mxu1 }
 0x1ef   :  { %2000 = vmax.xlane.f32.xlu0 %v1999_v46  ;;  %v1747_v14 = vpop.f32.mrb[54].mxu0  ;;  %v1793_v49 = vpop.f32.mrb[54].mxu1 }
 0x1f0   :  { %v3707_v50 = vpop.f32.mrb[55].mxu0  ;;  %v1990_v51 = vadd.f32 %v1982_v43, %v92_v42  ;;  %v3713_v52 = vpop.f32.mrb[55].mxu1  ;;  %v1991_v54 = vadd.f32 %v1983_v47, %v93_v16 }
 0x1f2   :  { %v2002_v53 = vsel %vm1611_vm2, %v1990_v51, -inf  ;;  %v2005_v60 = vsel %vm1611_vm2, %v1991_v54, -inf }
 0x1f3   :  { %2003 = vmax.xlane.f32.xlu1 %v2002_v53 }
 0x1f5   :  { %v1836_v56 = vpop.f32.mrb[56].mxu0  ;;  %v1882_v55 = vpop.f32.mrb[56].mxu1 }
 0x1f6   :  { %v1984_v58 = vmul.f32 0.35355338, %v1836_v56  ;;  %v3718_v59 = vpop.f32.mrb[57].mxu0  ;;  %v1985_v0 = vmul.f32 0.35355338, %v1882_v55  ;;  %v3724_v3 = vpop.f32.mrb[57].mxu1 }
 0x1f7   :  { %2006 = vmax.xlane.f32.xlu1 %v2005_v60  ;;  %v1839_v4 = vpop.f32.mrb[58].mxu0  ;;  %v1885_v7 = vpop.f32.mrb[58].mxu1 }
 0x1f8   :  { %v3719_v9 = vpop.f32.mrb[59].mxu0  ;;  %v1992_v10 = vadd.f32 %v1984_v58, %v94_v57  ;;  %v3725_v61 = vpop.f32.mrb[59].mxu1  ;;  %v1993_v12 = vadd.f32 %v1985_v0, %v95_v62 }
 0x1fa   :  { %v2008_v13 = vsel %vm1611_vm2, %v1992_v10, -inf  ;;  %v2011_v17 = vsel %vm1611_vm2, %v1993_v12, -inf }
 0x1fb   :  { %2009 = vmax.xlane.f32.xlu0 %v2008_v13  ;;  %2012 = vmax.xlane.f32.xlu1 %v2011_v17 }
 0x1fd   :  { %v1928_v18 = vpop.f32.mrb[60].mxu0  ;;  %v1974_v22 = vpop.f32.mrb[60].mxu1 }
 0x1fe   :  { %v1986_v63 = vmul.f32 0.35355338, %v1928_v18  ;;  %v3730_v23 = vpop.f32.mrb[61].mxu0  ;;  %v1987_v25 = vmul.f32 0.35355338, %v1974_v22  ;;  %v3736_v26 = vpop.f32.mrb[61].mxu1 }
 0x1ff   :  { %v1931_v27 = vpop.f32.mrb[62].mxu0  ;;  %v1977_v28 = vpop.f32.mrb[62].mxu1  ;;  %v3292_v23 = vld [vmem:[%s4821_s7 + $0x3] ss:$0 sm:$0xff] }
 0x200   :  { %v3731_v29 = vpop.f32.mrb[63].mxu0  ;;  %v1994_v30 = vadd.f32 %v1986_v63, %v96_v19  ;;  %v3737_v31 = vpop.f32.mrb[63].mxu1  ;;  %v1995_v32 = vadd.f32 %v1987_v25, %v97_v24  ;;  %v3291_v19 = vld [vmem:[%s4821_s7 + $0x2] ss:$0 sm:$0xff]  ;;  %v1382_v26 = vadd.f32 %v3292_v23, %v4521_v5  ;;  %v3294_v5 = vld [vmem:[%s4821_s7 + $0x5] ss:$0 sm:$0xff] }
 0x201   :  { %v1330_v63 = vadd.f32 %v3291_v19, %v4518_v2  ;;  %v3293_v29 = vld [vmem:[%s4821_s7 + $0x4] ss:$0 sm:$0xff] }
 0x202   :  { %v2014_v6 = vsel %vm1611_vm2, %v1994_v30, -inf  ;;  %v2017_v33 = vsel %vm1611_vm2, %v1995_v32, -inf }
 0x203   :  { %2015 = vmax.xlane.f32.xlu0 %v2014_v6  ;;  %2018 = vmax.xlane.f32.xlu1 %v2017_v33  ;;  %v2094_v25 = vpack.c.bf16 %v1330_v63, %v1330_v63  ;;  %v1434_v6 = vadd.f32 %v3293_v29, %v4523_v11  ;;  %v2480_v63 = vld [vmem:[%s4822_s8 + $0xc] sm:$0xf] }
 0x205   :  { %v2197_v2 = vsel %vm2103_vm3, %v2094_v25, 0 }
 0x278   :  { %v1998_v34 = vpop.xlane.xlu0 %1997 }
 0x279   :  { %v2020_v35 = vsub.f32 %v4537_v38, %v1998_v34 }
 0x27b   :  { %v2028_v36 = vmul.f32 1.442695, %v2020_v35 }
 0x27c   :  { %v2001_v37 = vpop.xlane.xlu0 %2000 }
 0x27d   :  { %3933 = vpow2.f32 %v2028_v36  ;;  %v2021_v39 = vsub.f32 %v4541_v40, %v2001_v37 }
 0x27f   :  { %v2030_v8 = vmul.f32 1.442695, %v2021_v39  ;;  %v2096_v39 = vpack.c.bf16 %v1434_v6, %v1434_v6 }
 0x280   :  { %v2004_v41 = vpop.xlane.xlu1 %2003 }
 0x281   :  { %3935 = vpow2.f32 %v2030_v8  ;;  %v2022_v42 = vsub.f32 %v1990_v51, %v2004_v41  ;;  %v1486_v8 = vadd.f32 %v3294_v5, %v4525_v15 }
 0x283   :  { %v2032_v43 = vmul.f32 1.442695, %v2022_v42  ;;  %v3295_v42 = vld [vmem:[%s4821_s7 + $0x6] ss:$0 sm:$0xff] }
 0x284   :  { %v2007_v44 = vpop.xlane.xlu1 %2006  ;;  %v1538_v15 = vadd.f32 %v3295_v42, %v4527_v20 }
 0x285   :  { %3937 = vpow2.f32 %v2032_v43  ;;  %v2023_v45 = vsub.f32 %v1991_v54, %v2007_v44 }
 0x287   :  { %v3934_v46 = vpop.eup %3933  ;;  %v2034_v47 = vmul.f32 1.442695, %v2023_v45  ;;  %v2289_v45 = vsel %vm2103_vm3, %v2096_v39, 0  ;;  %v2483_v39 = vld [vmem:[%s4822_s8 + $0x18] sm:$0xf] }
 0x288   :  { %v2010_v48 = vpop.xlane.xlu0 %2009  ;;  %v2044_v14 = vsel %vm1611_vm2, %v3934_v46, 0.0  ;;  %v2013_v38 = vpop.xlane.xlu1 %2012 }
 0x289   :  { %3939 = vpow2.f32 %v2034_v47  ;;  %v2024_v16 = vsub.f32 %v1992_v10, %v2010_v48  ;;  %2045 = vadd.xlane.f32.xlu0 %v2044_v14  ;;  %v2025_v49 = vsub.f32 %v1993_v12, %v2013_v38  ;;  %v3296_v14 = vld [vmem:[%s4821_s7 + $0x7] ss:$0 sm:$0xff] }
 0x28b   :  { %v3936_v50 = vpop.eup %3935  ;;  %v2036_v40 = vmul.f32 1.442695, %v2024_v16  ;;  %v2038_v52 = vmul.f32 1.442695, %v2025_v49 }
 0x28c   :  { %v2047_v53 = vsel %vm1611_vm2, %v3936_v50, 0.0 }
 0x28d   :  { %3941 = vpow2.f32 %v2036_v40  ;;  %2048 = vadd.xlane.f32.xlu1 %v2047_v53  ;;  %v2098_v40 = vpack.c.bf16 %v1538_v15, %v1538_v15 }
 0x28e   :  { %3943 = vpow2.f32 %v2038_v52  ;;  %v1590_v52 = vadd.f32 %v3296_v14, %v4529_v21 }
 0x28f   :  { %v3938_v51 = vpop.eup %3937 }
 0x290   :  { %v2016_v54 = vpop.xlane.xlu0 %2015  ;;  %v2050_v56 = vsel %vm1611_vm2, %v3938_v51, 0.0  ;;  %v2019_v57 = vpop.xlane.xlu1 %2018 }
 0x291   :  { %v2026_v58 = vsub.f32 %v1994_v30, %v2016_v54  ;;  %2051 = vadd.xlane.f32.xlu0 %v2050_v56  ;;  %v2027_v55 = vsub.f32 %v1995_v32, %v2019_v57  ;;  %v2095_v32 = vpack.c.bf16 %v1382_v26, %v1382_v26  ;;  %v2381_v56 = vsel %vm2103_vm3, %v2098_v40, 0 }
 0x292   :  { %v2099_v57 = vpack.c.bf16 %v1590_v52, %v1590_v52  ;;  %v2627_v26 = vsel %vm2103_vm3, %v2480_v63, 0 }
 0x293   :  { %v4574_v59 = vpop.eup %3939  ;;  %v2040_v60 = vmul.f32 1.442695, %v2026_v58  ;;  %v2042_v62 = vmul.f32 1.442695, %v2027_v55  ;;  %v2243_v11 = vsel %vm2103_vm3, %v2095_v32, 0 }
 0x294   :  { %v2053_v0 = vsel %vm1611_vm2, %v4574_v59, 0.0  ;;  %v2477_v55 = vld [vmem:[%s4822_s8] sm:$0xf] }
 0x295   :  { %3945 = vpow2.f32 %v2040_v60  ;;  %2054 = vadd.xlane.f32.xlu1 %v2053_v0  ;;  %v2427_v60 = vsel %vm2103_vm3, %v2099_v57, 0 }
 0x296   :  { %3947 = vpow2.f32 %v2042_v62 }
 0x297   :  { %v4578_v3 = vpop.eup %3941 }
 0x298   :  { %v4580_v4 = vpop.eup %3943  ;;  %v2056_v7 = vsel %vm1611_vm2, %v4578_v3, 0.0 }
 0x299   :  { %v2059_v9 = vsel %vm1611_vm2, %v4580_v4, 0.0  ;;  %2057 = vadd.xlane.f32.xlu0 %v2056_v7 }
 0x29a   :  { %2060 = vadd.xlane.f32.xlu1 %v2059_v9  ;;  %v2478_v9 = vld [vmem:[%s4822_s8 + $0x4] sm:$0xf] }
 0x29f   :  { %v4586_v10 = vpop.eup %3945 }
 0x2a0   :  { %v4588_v61 = vpop.eup %3947  ;;  %v2062_v12 = vsel %vm1611_vm2, %v4586_v10, 0.0 }
 0x2a1   :  { %v2065_v13 = vsel %vm1611_vm2, %v4588_v61, 0.0  ;;  %2063 = vadd.xlane.f32.xlu0 %v2062_v12 }
 0x2a2   :  { %2066 = vadd.xlane.f32.xlu1 %v2065_v13 }
 0x316   :  { %v2046_v17 = vpop.xlane.xlu0 %2045 }
 0x317   :  { %3949 = vrcp.f32 %v2046_v17 }
 0x31a   :  { %v2049_v18 = vpop.xlane.xlu1 %2048 }
 0x31b   :  { %3951 = vrcp.f32 %v2049_v18 }
 0x31e   :  { %v2052_v22 = vpop.xlane.xlu0 %2051 }
 0x31f   :  { %3953 = vrcp.f32 %v2052_v22 }
 0x321   :  { %v3950_v24 = vpop.eup %3949 }
 0x322   :  { %v2076_v27 = vmul.f32 %v3950_v24, %v3934_v46  ;;  %v2055_v28 = vpop.xlane.xlu1 %2054  ;;  %v2097_v46 = vpack.c.bf16 %v1486_v8, %v1486_v8 }
 0x323   :  { %3955 = vrcp.f32 %v2055_v28  ;;  %v2481_v28 = vld [vmem:[%s4822_s8 + $0x10] sm:$0xf] }
 0x324   :  { %v2084_v30 = vpack.c.bf16 %v2076_v27, %v2076_v27  ;;  %v2673_v32 = vsel %vm2103_vm3, %v2481_v28, 0 }
 0x325   :  { %v3952_v31 = vpop.eup %3951 }
 0x326   :  { %v2077_v33 = vmul.f32 %v3952_v31, %v3936_v50  ;;  %3741 = vmatmul.mubr.msk.bf16.vlgmr.msra.gmra.mrb[64].mxu0 %vm1611_vm2, %v2084_v30  ;;  %v2058_v34 = vpop.xlane.xlu0 %2057  ;;  %v2335_v50 = vsel %vm2103_vm3, %v2097_v46, 0  ;;  %v2484_v46 = vld [vmem:[%s4822_s8 + $0x1c] sm:$0xf] }
 0x327   :  { %v2061_v35 = vpop.xlane.xlu1 %2060  ;;  %3751 = vmatpush3.bf16.msra.mxu0 %v2197_v2  ;;  %3957 = vrcp.f32 %v2058_v34  ;;  %3752 = vmatprep.mubr.msk.bf16.mxu0 %vm4000_vm0, %v3999_v1 }
 0x328   :  { %3959 = vrcp.f32 %v2061_v35  ;;  %v2085_v36 = vpack.c.bf16 %v2077_v33, %v2077_v33  ;;  %3762 = vmatprep.subr.bf16.mxu0 %v3999_v1  ;;  %v2482_v33 = vld [vmem:[%s4822_s8 + $0x14] sm:$0xf] }
 0x329   :  { %v3954_v37 = vpop.eup %3953 }
 0x32a   :  { %v2078_v41 = vmul.f32 %v3954_v37, %v3938_v51  ;;  %3747 = vmatmul.mubr.msk.bf16.vlgmr.msra.gmra.mrb[64].mxu1 %vm1611_vm2, %v2085_v36  ;;  %v2719_v37 = vsel %vm2103_vm3, %v2482_v33, 0 }
 0x32b   :  { %3757 = vmatpush3.bf16.msra.mxu1 %v2243_v11  ;;  %3758 = vmatprep.mubr.msk.bf16.mxu1 %vm4000_vm0, %v3999_v1 }
 0x32c   :  { %v2086_v43 = vpack.c.bf16 %v2078_v41, %v2078_v41  ;;  %3768 = vmatprep.subr.bf16.mxu1 %v3999_v1 }
 0x32d   :  { %v3956_v44 = vpop.eup %3955 }
 0x32e   :  { %v2079_v47 = vmul.f32 %v3956_v44, %v4574_v59  ;;  %3753 = vmatmul.mubr.msk.bf16.vlgmr.msra.gmra.mrb[68].mxu0 %vm1611_vm2, %v2086_v43  ;;  %v2064_v48 = vpop.xlane.xlu0 %2063  ;;  %v2765_v44 = vsel %vm2103_vm3, %v2483_v39, 0 }
 0x32f   :  { %v2067_v38 = vpop.xlane.xlu1 %2066  ;;  %3763 = vmatpush3.bf16.msra.mxu0 %v2289_v45  ;;  %3961 = vrcp.f32 %v2064_v48  ;;  %3764 = vmatprep.mubr.msk.bf16.mxu0 %vm4000_vm0, %v3999_v1 }
 0x330   :  { %3963 = vrcp.f32 %v2067_v38  ;;  %v2087_v16 = vpack.c.bf16 %v2079_v47, %v2079_v47  ;;  %3774 = vmatprep.subr.bf16.mxu0 %v3999_v1  ;;  %v2811_v38 = vsel %vm2103_vm3, %v2484_v46, 0 }
 0x331   :  { %v3958_v20 = vpop.eup %3957 }
 0x332   :  { %v3960_v49 = vpop.eup %3959  ;;  %v2080_v53 = vmul.f32 %v3958_v20, %v4578_v3  ;;  %3759 = vmatmul.mubr.msk.bf16.vlgmr.msra.gmra.mrb[68].mxu1 %vm1611_vm2, %v2087_v16 }
 0x333   :  { %3769 = vmatpush3.bf16.msra.mxu1 %v2335_v50  ;;  %3770 = vmatprep.mubr.msk.bf16.mxu1 %vm4000_vm0, %v3999_v1  ;;  %v2081_v51 = vmul.f32 %v3960_v49, %v4580_v4  ;;  %v2489_v4 = vsel %vm2103_vm3, %v2477_v55, 0 }
 0x334   :  { %v2088_v54 = vpack.c.bf16 %v2080_v53, %v2080_v53  ;;  %3780 = vmatprep.subr.bf16.mxu1 %v3999_v1 }
 0x335   :  { %v2089_v21 = vpack.c.bf16 %v2081_v51, %v2081_v51 }
 0x336   :  { %3765 = vmatmul.mubr.msk.bf16.vlgmr.msra.gmra.mrb[72].mxu0 %vm1611_vm2, %v2088_v54 }
 0x337   :  { %3775 = vmatpush3.bf16.msra.mxu0 %v2381_v56  ;;  %3776 = vmatprep.mubr.msk.bf16.mxu0 %vm4000_vm0, %v3999_v1 }
 0x338   :  { %3786 = vmatprep.subr.bf16.mxu0 %v3999_v1 }
 0x339   :  { %v3962_v58 = vpop.eup %3961 }
 0x33a   :  { %v3964_v59 = vpop.eup %3963  ;;  %v2082_v62 = vmul.f32 %v3962_v58, %v4586_v10  ;;  %3771 = vmatmul.mubr.msk.bf16.vlgmr.msra.gmra.mrb[72].mxu1 %vm1611_vm2, %v2089_v21  ;;  %v2535_v10 = vsel %vm2103_vm3, %v2478_v9, 0 }
 0x33b   :  { %3781 = vmatpush3.bf16.msra.mxu1 %v2427_v60  ;;  %3782 = vmatprep.mubr.msk.bf16.mxu1 %vm4000_vm0, %v3999_v1  ;;  %v2083_v0 = vmul.f32 %v3964_v59, %v4588_v61  ;;  %v2479_v61 = vld [vmem:[%s4822_s8 + $0x8] sm:$0xf] }
 0x33c   :  { %v2090_v3 = vpack.c.bf16 %v2082_v62, %v2082_v62  ;;  %3792 = vmatprep.subr.bf16.mxu1 %v3999_v1  ;;  %v2581_v18 = vsel %vm2103_vm3, %v2479_v61, 0 }
 0x33d   :  { %v2091_v7 = vpack.c.bf16 %v2083_v0, %v2083_v0 }
 0x33e   :  { %3777 = vmatmul.mubr.msk.bf16.vlgmr.msra.gmra.mrb[76].mxu0 %vm1611_vm2, %v2090_v3 }
 0x33f   :  { %3787 = vmatpush3.bf16.msra.mxu0 %v2489_v4  ;;  %3788 = vmatprep.mubr.msk.bf16.mxu0 %vm4000_vm0, %v3999_v1 }
 0x340   :  { %3798 = vmatprep.subr.bf16.mxu0 %v3999_v1 }
 0x342   :  { %3783 = vmatmul.mubr.msk.bf16.vlgmr.msra.gmra.mrb[76].mxu1 %vm1611_vm2, %v2091_v7 }
 0x343   :  { %3794 = vmatprep.mubr.msk.bf16.mxu1 %vm4000_vm0, %v3999_v1  ;;  %3793 = vmatpush3.bf16.msra.mxu1 %v2535_v10 }
 0x344   :  { %3804 = vmatprep.subr.bf16.mxu1 %v3999_v1 }
 0x3f9   :  { %v2141_v12 = vpop.f32.mrb[64].mxu0 }
 0x3fa   :  { %v2469_v13 = vpack.c.bf16 %v2141_v12, %v2141_v12  ;;  %v3742_v17 = vpop.f32.mrb[65].mxu0 }
 0x3fb   :  { %v2144_v19 = vpop.f32.mrb[66].mxu0 }
 0x3fc   :  { %v3743_v22 = vpop.f32.mrb[67].mxu0  ;;  %3789 = vmatmul.mubr.msk.bf16.vlgmr.msra.gmra.mrb[80].mxu0 %vm1611_vm2, %v2469_v13 }
 0x3fd   :  { %v2187_v23 = vpop.f32.mrb[64].mxu1  ;;  %3799 = vmatpush3.bf16.msra.mxu0 %v2581_v18  ;;  %3800 = vmatprep.mubr.msk.bf16.mxu0 %vm4000_vm0, %v3999_v1  ;;  %v3345_v22 = vld [vmem:[%s4823_s9] ss:$0 sm:$0xff] }
 0x3fe   :  { %v2470_v24 = vpack.c.bf16 %v2187_v23, %v2187_v23  ;;  %v3748_v25 = vpop.f32.mrb[65].mxu1  ;;  %3810 = vmatprep.subr.bf16.mxu0 %v3999_v1 }
 0x3ff   :  { %v2190_v27 = vpop.f32.mrb[66].mxu1 }
 0x400   :  { %v3749_v29 = vpop.f32.mrb[67].mxu1  ;;  %3795 = vmatmul.mubr.msk.bf16.vlgmr.msra.gmra.mrb[80].mxu1 %vm1611_vm2, %v2470_v24 }
 0x401   :  { %v2233_v30 = vpop.f32.mrb[68].mxu0  ;;  %3805 = vmatpush3.bf16.msra.mxu1 %v2627_v26  ;;  %3806 = vmatprep.mubr.msk.bf16.mxu1 %vm4000_vm0, %v3999_v1 }
 0x402   :  { %v2471_v31 = vpack.c.bf16 %v2233_v30, %v2233_v30  ;;  %v3754_v2 = vpop.f32.mrb[69].mxu0  ;;  %3816 = vmatprep.subr.bf16.mxu1 %v3999_v1 }
 0x403   :  { %v2236_v6 = vpop.f32.mrb[70].mxu0  ;;  %v3973_v2 = vld [vmem:[%s4840_s23] sm:$0xff] }
 0x404   :  { %v3755_v34 = vpop.f32.mrb[71].mxu0  ;;  %3801 = vmatmul.mubr.msk.bf16.vlgmr.msra.gmra.mrb[84].mxu0 %vm1611_vm2, %v2471_v31 }
 0x405   :  { %v2279_v5 = vpop.f32.mrb[68].mxu1  ;;  %3811 = vmatpush3.bf16.msra.mxu0 %v2673_v32  ;;  %3812 = vmatprep.mubr.msk.bf16.mxu0 %vm4000_vm0, %v3999_v1 }
 0x406   :  { %v2472_v35 = vpack.c.bf16 %v2279_v5, %v2279_v5  ;;  %v3760_v36 = vpop.f32.mrb[69].mxu1  ;;  %3822 = vmatprep.subr.bf16.mxu0 %v3999_v1 }
 0x407   :  { %v2282_v11 = vpop.f32.mrb[70].mxu1 }
 0x408   :  { %v3761_v8 = vpop.f32.mrb[71].mxu1  ;;  %3807 = vmatmul.mubr.msk.bf16.vlgmr.msra.gmra.mrb[84].mxu1 %vm1611_vm2, %v2472_v35 }
 0x409   :  { %v2325_v41 = vpop.f32.mrb[72].mxu0  ;;  %3817 = vmatpush3.bf16.msra.mxu1 %v2719_v37  ;;  %3818 = vmatprep.mubr.msk.bf16.mxu1 %vm4000_vm0, %v3999_v1 }
 0x40a   :  { %v2473_v42 = vpack.c.bf16 %v2325_v41, %v2325_v41  ;;  %v3766_v43 = vpop.f32.mrb[73].mxu0  ;;  %3828 = vmatprep.subr.bf16.mxu1 %v3999_v1 }
 0x40b   :  { %v2328_v45 = vpop.f32.mrb[74].mxu0 }
 0x40c   :  { %v3767_v15 = vpop.f32.mrb[75].mxu0  ;;  %3813 = vmatmul.mubr.msk.bf16.vlgmr.msra.gmra.mrb[88].mxu0 %vm1611_vm2, %v2473_v42 }
 0x40d   :  { %v2371_v47 = vpop.f32.mrb[72].mxu1  ;;  %3823 = vmatpush3.bf16.msra.mxu0 %v2765_v44  ;;  %3824 = vmatprep.mubr.msk.bf16.mxu0 %vm4000_vm0, %v3999_v1 }
 0x40e   :  { %v2474_v48 = vpack.c.bf16 %v2371_v47, %v2371_v47  ;;  %v3772_v14 = vpop.f32.mrb[73].mxu1  ;;  %3834 = vmatprep.subr.bf16.mxu0 %v3999_v1 }
 0x40f   :  { %v2374_v16 = vpop.f32.mrb[74].mxu1 }
 0x410   :  { %v3773_v20 = vpop.f32.mrb[75].mxu1  ;;  %3819 = vmatmul.mubr.msk.bf16.vlgmr.msra.gmra.mrb[88].mxu1 %vm1611_vm2, %v2474_v48 }
 0x411   :  { %v2417_v49 = vpop.f32.mrb[76].mxu0  ;;  %3829 = vmatpush3.bf16.msra.mxu1 %v2811_v38  ;;  %3830 = vmatprep.mubr.msk.bf16.mxu1 %vm4000_vm0, %v3999_v1  ;;  %v3974_v20 = vld [vmem:[%s4840_s23 + $0x8] sm:$0xff] }
 0x412   :  { %v2475_v50 = vpack.c.bf16 %v2417_v49, %v2417_v49  ;;  %v3778_v40 = vpop.f32.mrb[77].mxu0  ;;  %3842 = vmatprep.subr.bf16.mxu1 %v3999_v1 }
 0x413   :  { %v2420_v52 = vpop.f32.mrb[78].mxu0 }
 0x414   :  { %v3779_v53 = vpop.f32.mrb[79].mxu0  ;;  %3825 = vmatmul.mubr.msk.bf16.vlgmr.msra.gmra.mrb[92].mxu0 %vm1611_vm2, %v2475_v50 }
 0x415   :  { %v2463_v51 = vpop.f32.mrb[76].mxu1  ;;  %3838 = vmatprep.mubr.msk.bf16.mxu0 %vm4000_vm0, %v3999_v1 }
 0x416   :  { %v2476_v54 = vpack.c.bf16 %v2463_v51, %v2463_v51  ;;  %v3784_v56 = vpop.f32.mrb[77].mxu1 }
 0x417   :  { %v2466_v57 = vpop.f32.mrb[78].mxu1 }
 0x418   :  { %v3785_v21 = vpop.f32.mrb[79].mxu1  ;;  %3831 = vmatmul.mubr.msk.bf16.vlgmr.msra.gmra.mrb[92].mxu1 %vm1611_vm2, %v2476_v54 }
 0x419   :  { %3846 = vmatprep.mubr.msk.bf16.mxu1 %vm4000_vm0, %v3999_v1 }
 0x4cf   :  { %v2525_v58 = vpop.f32.mrb[80].mxu0 }
 0x4d0   :  { %v3790_v55 = vpop.f32.mrb[81].mxu0  ;;  %v2853_v0 = vsel %vm192_vm1, %v2525_v58, 0.0 }
 0x4d1   :  { %v2528_v59 = vpop.f32.mrb[82].mxu0 }
 0x4d2   :  { %v3791_v60 = vpop.f32.mrb[83].mxu0  ;;  %v3927_v59 = vld [vmem:[%s4824_s10] sm:$0xff]  }
 0x4d3   :  { %v2571_v62 = vpop.f32.mrb[80].mxu1  ;;  %3835 = vmatpush3.bf16.msra.mxu0 %v3927_v59  ;;  %3843 = vmatpush3.bf16.msra.mxu1 %v3927_v59  ;;  %v3928_v60 = vld [vmem:[%s4824_s10 + $0x8] sm:$0xff]  }
 0x4d4   :  { %v2854_v3 = vsel %vm192_vm1, %v2571_v62, 0.0  ;;  %v3796_v4 = vpop.f32.mrb[81].mxu1  ;;  %3836 = vmatprep.subr.bf16.mxu0 %v3999_v1  ;;  %3844 = vmatprep.subr.bf16.mxu1 %v3999_v1 }
 0x4d5   :  { %v2855_v7 = vadd.f32 %v2854_v3, %v2853_v0  ;;  %v2574_v9 = vpop.f32.mrb[82].mxu1 }
 0x4d6   :  { %v3797_v10 = vpop.f32.mrb[83].mxu1 }
 0x4d7   :  { %v2617_v61 = vpop.f32.mrb[84].mxu0  ;;  %3837 = vmatpush3.bf16.msra.mxu0 %v3928_v60  ;;  %3845 = vmatpush3.bf16.msra.mxu1 %v3928_v60 }
 0x4d8   :  { %v2856_v12 = vsel %vm192_vm1, %v2617_v61, 0.0  ;;  %v3802_v13 = vpop.f32.mrb[85].mxu0  ;;  %3850 = vmatprep.subr.bf16.mxu0 %v3999_v1  ;;  %3862 = vmatprep.subr.bf16.mxu1 %v3999_v1 }
 0x4d9   :  { %v2857_v17 = vadd.f32 %v2856_v12, %v2855_v7  ;;  %v2620_v18 = vpop.f32.mrb[86].mxu0  ;;  %v3346_v7 = vld [vmem:[%s4828_s14] ss:$0 sm:$0xff] }
 0x4da   :  { %v3803_v19 = vpop.f32.mrb[87].mxu0  ;;  %v3347_v12 = vld [vmem:[%s4829_s15] ss:$0 sm:$0xff] }
 0x4db   :  { %v2663_v63 = vpop.f32.mrb[84].mxu1  ;;  %v3929_v19 = vld [vmem:[%s4826_s12] sm:$0xff]  }
 0x4dc   :  { %v2858_v23 = vsel %vm192_vm1, %v2663_v63, 0.0  ;;  %v3808_v24 = vpop.f32.mrb[85].mxu1 }
 0x4dd   :  { %v2859_v25 = vadd.f32 %v2858_v23, %v2857_v17  ;;  %v2666_v26 = vpop.f32.mrb[86].mxu1 }
 0x4de   :  { %v3809_v27 = vpop.f32.mrb[87].mxu1 }
 0x4df   :  { %v2873_v28 = vadd.f32 %v3345_v22, %v2859_v25  ;;  %v2709_v29 = vpop.f32.mrb[88].mxu0 }
 0x4e0   :  { %v3814_v30 = vpop.f32.mrb[89].mxu0  ;;  %v2860_v5 = vsel %vm192_vm1, %v2709_v29, 0.0  ;;  %v3932_v29 = vld [vmem:[%s4826_s12 + $0x18] sm:$0xff]  }
 0x4e1   :  { %v2712_v31 = vpop.f32.mrb[90].mxu0  ;;  %v2875_v32 = vadd.f32 %v3973_v2, %v2873_v28  ;;  %v3931_v28 = vld [vmem:[%s4826_s12 + $0x10] sm:$0xff]   ;;  %v3348_v30 = vld [vmem:[%s4825_s11] ss:$0 sm:$0xff] }
 0x4e2   :  { %v3815_v6 = vpop.f32.mrb[91].mxu0 }
 0x4e3   :  { %v2755_v33 = vpop.f32.mrb[88].mxu1  ;;  %v2879_v34 = vsel %vm192_vm1, %v2875_v32, 0.0 }
 0x4e4   :  { %v2861_v35 = vsel %vm192_vm1, %v2755_v33, 0.0  ;;  %v3820_v36 = vpop.f32.mrb[89].mxu1  ;;  %2880 = vadd.xlane.f32.xlu0 %v2879_v34 }
 0x4e5   :  { %v2862_v37 = vadd.f32 %v2861_v35, %v2860_v5  ;;  %v2758_v11 = vpop.f32.mrb[90].mxu1 }
 0x4e6   :  { %v3821_v39 = vpop.f32.mrb[91].mxu1 }
 0x4e7   :  { %v2801_v8 = vpop.f32.mrb[92].mxu0 }
 0x4e8   :  { %v2863_v41 = vsel %vm192_vm1, %v2801_v8, 0.0  ;;  %v3826_v42 = vpop.f32.mrb[93].mxu0 }
 0x4e9   :  { %v2864_v43 = vadd.f32 %v2863_v41, %v2862_v37  ;;  %v2804_v44 = vpop.f32.mrb[94].mxu0  ;;  %v3353_v41 = vld [vmem:[%s4827_s13] ss:$0 sm:$0xff] }
 0x4ea   :  { %v3827_v45 = vpop.f32.mrb[95].mxu0 }
 0x4eb   :  { %v2847_v46 = vpop.f32.mrb[92].mxu1 }
 0x4ec   :  { %v2865_v15 = vsel %vm192_vm1, %v2847_v46, 0.0  ;;  %v3832_v47 = vpop.f32.mrb[93].mxu1 }
 0x4ed   :  { %v2866_v48 = vadd.f32 %v2865_v15, %v2864_v43  ;;  %v2850_v14 = vpop.f32.mrb[94].mxu1 }
 0x4ee   :  { %v3833_v38 = vpop.f32.mrb[95].mxu1 }
 0x4ef   :  { %v2874_v16 = vadd.f32 %v3345_v22, %v2866_v48  ;;  %v3930_v22 = vld [vmem:[%s4826_s12 + $0x8] sm:$0xff]  }
 0x4f1   :  { %v2876_v49 = vadd.f32 %v3974_v20, %v2874_v16 }
 0x4f3   :  { %v2882_v50 = vsel %vm192_vm1, %v2876_v49, 0.0 }
 0x4f4   :  { %2883 = vadd.xlane.f32.xlu1 %v2882_v50 }
 0x571   :  { %v2881_v40 = vpop.xlane.xlu0 %2880 }
 0x572   :  { %v2886_v52 = vmul.f32 0.03125, %v2881_v40 }
 0x574   :  { %v2888_v53 = vsub.f32 %v2875_v32, %v2886_v52 }
 0x576   :  { %v2890_v51 = vmul.f32 %v2888_v53, %v2888_v53 }
 0x578   :  { %v2892_v54 = vsel %vm192_vm1, %v2890_v51, 0.0 }
 0x579   :  { %2893 = vadd.xlane.f32.xlu0 %v2892_v54 }
 0x581   :  { %v2884_v56 = vpop.xlane.xlu1 %2883 }
 0x582   :  { %v2887_v57 = vmul.f32 0.03125, %v2884_v56 }
 0x584   :  { %v2889_v21 = vsub.f32 %v2876_v49, %v2887_v57 }
 0x586   :  { %v2891_v58 = vmul.f32 %v2889_v21, %v2889_v21 }
 0x588   :  { %v2895_v55 = vsel %vm192_vm1, %v2891_v58, 0.0 }
 0x589   :  { %2896 = vadd.xlane.f32.xlu1 %v2895_v55 }
 0x606   :  { %v2894_v62 = vpop.xlane.xlu0 %2893 }
 0x607   :  { %v2898_v0 = vmul.f32 0.03125, %v2894_v62 }
 0x609   :  { %v2900_v3 = vadd.f32 1e-05, %v2898_v0 }
 0x60b   :  { %3965 = vrsqrt.f32 %v2900_v3  ;;  %v3360_v3 = vld [vmem:[%s4830_s16] ss:$0 sm:$0xff]  ;;  %s3975_s16 = scalar_lea.vmem %s3215_s5, 256 }
 0x60c   :  { %p3976_p0 = scmp.ne.s32.totalorder %s3215_s5, %s3975_s16  ;;  %p3981_p2 = scmp.lt.s32.totalorder %s3975_s16, %s3975_s16 }
 0x60e   :  { %p3982_p3 = por %p3981_p2, %p3980_p1 }
 0x610   :  { %p3983_p4 = pnand %p3982_p3, %p3976_p0 }
 0x615   :  { %v3966_v4 = vpop.eup %3965 }
 0x616   :  { %v2904_v9 = vmul.f32 %v3966_v4, %v2888_v53  ;;  %v2897_v10 = vpop.xlane.xlu1 %2896 }
 0x617   :  { %v2899_v61 = vmul.f32 0.03125, %v2897_v10  ;;  %v3361_v10 = vld [vmem:[%s4831_s17] ss:$0 sm:$0xff] }
 0x618   :  { %v2912_v13 = vmul.f32 %v3346_v7, %v2904_v9 }
 0x619   :  { %v2901_v17 = vadd.f32 1e-05, %v2899_v61 }
 0x61a   :  { %v2920_v18 = vadd.f32 %v3347_v12, %v2912_v13 }
 0x61b   :  { %3967 = vrsqrt.f32 %v2901_v17 }
 0x61c   :  { %v2934_v63 = vpack.c.bf16 %v2920_v18, %v2920_v18 }
 0x61e   :  { %3839 = vmatmul.mubr.msk.bf16.vlgmr.msra.gmra.mrb[96].mxu0 %vm192_vm1, %v2934_v63 }
 0x61f   :  { %3851 = vmatpush3.bf16.msra.mxu0 %v3929_v19  ;;  %3858 = vmatprep.mubr.msk.bf16.mxu0 %vm4000_vm0, %v3999_v1 }
 0x620   :  { %3852 = vmatprep.subr.bf16.mxu0 %v3999_v1 }
 0x623   :  { %3853 = vmatpush3.bf16.msra.mxu0 %v3930_v22 }
 0x624   :  { %3854 = vmatprep.subr.bf16.mxu0 %v3999_v1 }
 0x625   :  { %v3968_v23 = vpop.eup %3967 }
 0x626   :  { %v2905_v24 = vmul.f32 %v3968_v23, %v2889_v21 }
 0x627   :  { %3855 = vmatpush3.bf16.msra.mxu0 %v3931_v28 }
 0x628   :  { %v2913_v25 = vmul.f32 %v3346_v7, %v2905_v24  ;;  %3856 = vmatprep.subr.bf16.mxu0 %v3999_v1 }
 0x62a   :  { %v2921_v26 = vadd.f32 %v3347_v12, %v2913_v25 }
 0x62b   :  { %3857 = vmatpush3.bf16.msra.mxu0 %v3932_v29 }
 0x62c   :  { %v2935_v27 = vpack.c.bf16 %v2921_v26, %v2921_v26 }
 0x62e   :  { %3847 = vmatmul.mubr.msk.bf16.vlgmr.msra.gmra.mrb[96].mxu1 %vm192_vm1, %v2935_v27 }
 0x62f   :  { %3863 = vmatpush3.bf16.msra.mxu1 %v3929_v19  ;;  %3870 = vmatprep.mubr.msk.bf16.mxu1 %vm4000_vm0, %v3999_v1 }
 0x630   :  { %3864 = vmatprep.subr.bf16.mxu1 %v3999_v1 }
 0x633   :  { %3865 = vmatpush3.bf16.msra.mxu1 %v3930_v22 }
 0x634   :  { %3866 = vmatprep.subr.bf16.mxu1 %v3999_v1 }
 0x637   :  { %3867 = vmatpush3.bf16.msra.mxu1 %v3931_v28 }
 0x638   :  { %3868 = vmatprep.subr.bf16.mxu1 %v3999_v1 }
 0x63b   :  { %3869 = vmatpush3.bf16.msra.mxu1 %v3932_v29 }
 0x6f1   :  { %v2991_v31 = vpop.f32.mrb[96].mxu0 }
 0x6f2   :  { %v2992_v2 = vadd.f32 %v3348_v30, %v2991_v31  ;;  %v3840_v32 = vpop.f32.mrb[97].mxu0 }
 0x6f3   :  { %v2994_v6 = vpop.f32.mrb[98].mxu0 }
 0x6f4   :  { %v3040_v33 = vmax.f32 %v2992_v2, 0.0  ;;  %v3841_v34 = vpop.f32.mrb[99].mxu0 }
 0x6f6   :  { %v3042_v5 = vpack.c.bf16 %v3040_v33, %v3040_v33 }
 0x6f8   :  { %3859 = vmatmul.mubr.msk.bf16.vlgmr.msra.gmra.mrb[100].mxu0 %vm3074_vm4, %v3042_v5 }
 0x701   :  { %v3034_v1 = vpop.f32.mrb[96].mxu1 }
 0x702   :  { %v3035_v35 = vadd.f32 %v3348_v30, %v3034_v1  ;;  %v3848_v36 = vpop.f32.mrb[97].mxu1 }
 0x703   :  { %v3037_v37 = vpop.f32.mrb[98].mxu1 }
 0x704   :  { %v3041_v11 = vmax.f32 %v3035_v35, 0.0  ;;  %v3849_v39 = vpop.f32.mrb[99].mxu1 }
 0x706   :  { %v3043_v8 = vpack.c.bf16 %v3041_v11, %v3041_v11 }
 0x708   :  { %3871 = vmatmul.mubr.msk.bf16.vlgmr.msra.gmra.mrb[100].mxu1 %vm3074_vm4, %v3043_v8 }
 0x7cb   :  { %v3112_v42 = vpop.f32.mrb[100].mxu0 }
 0x7cc   :  { %v3113_v43 = vadd.f32 %v3353_v41, %v3112_v42  ;;  %v3860_v44 = vpop.f32.mrb[101].mxu0 }
 0x7cd   :  { %v3115_v45 = vpop.f32.mrb[102].mxu0 }
 0x7ce   :  { %v3861_v46 = vpop.f32.mrb[103].mxu0  ;;  %v3161_v15 = vadd.f32 %v3113_v43, %v2920_v18 }
 0x7d0   :  { %v3165_v47 = vsel %vm192_vm1, %v3161_v15, 0.0 }
 0x7d1   :  { %3166 = vadd.xlane.f32.xlu0 %v3165_v47 }
 0x7db   :  { %v3155_v48 = vpop.f32.mrb[100].mxu1 }
 0x7dc   :  { %v3156_v14 = vadd.f32 %v3353_v41, %v3155_v48  ;;  %v3872_v38 = vpop.f32.mrb[101].mxu1 }
 0x7dd   :  { %v3158_v16 = vpop.f32.mrb[102].mxu1 }
 0x7de   :  { %v3873_v20 = vpop.f32.mrb[103].mxu1  ;;  %v3162_v49 = vadd.f32 %v3156_v14, %v2921_v26 }
 0x7e0   :  { %v3168_v50 = vsel %vm192_vm1, %v3162_v49, 0.0 }
 0x7e1   :  { %3169 = vadd.xlane.f32.xlu1 %v3168_v50 }
 0x85e   :  { %v3167_v40 = vpop.xlane.xlu0 %3166 }
 0x85f   :  { %v3171_v52 = vmul.f32 0.03125, %v3167_v40 }
 0x861   :  { %v3173_v53 = vsub.f32 %v3161_v15, %v3171_v52 }
 0x863   :  { %v3175_v51 = vmul.f32 %v3173_v53, %v3173_v53 }
 0x865   :  { %v3177_v54 = vsel %vm192_vm1, %v3175_v51, 0.0 }
 0x866   :  { %3178 = vadd.xlane.f32.xlu0 %v3177_v54 }
 0x86e   :  { %v3170_v56 = vpop.xlane.xlu1 %3169 }
 0x86f   :  { %v3172_v57 = vmul.f32 0.03125, %v3170_v56 }
 0x871   :  { %v3174_v21 = vsub.f32 %v3162_v49, %v3172_v57 }
 0x873   :  { %v3176_v58 = vmul.f32 %v3174_v21, %v3174_v21 }
 0x875   :  { %v3180_v55 = vsel %vm192_vm1, %v3176_v58, 0.0 }
 0x876   :  { %3181 = vadd.xlane.f32.xlu1 %v3180_v55 }
 0x8f3   :  { %v3179_v59 = vpop.xlane.xlu0 %3178 }
 0x8f4   :  { %v3183_v60 = vmul.f32 0.03125, %v3179_v59 }
 0x8f6   :  { %v3185_v62 = vadd.f32 1e-05, %v3183_v60 }
 0x8f8   :  { %3969 = vrsqrt.f32 %v3185_v62 }
 0x902   :  { %v3970_v0 = vpop.eup %3969 }
 0x903   :  { %v3189_v4 = vmul.f32 %v3970_v0, %v3173_v53  ;;  %v3182_v7 = vpop.xlane.xlu1 %3181 }
 0x904   :  { %v3184_v9 = vmul.f32 0.03125, %v3182_v7 }
 0x905   :  { %v3197_v61 = vmul.f32 %v3360_v3, %v3189_v4 }
 0x906   :  { %v3186_v12 = vadd.f32 1e-05, %v3184_v9 }
 0x907   :  { %v3205_v13 = vadd.f32 %v3361_v10, %v3197_v61 }
 0x908   :  { %3971 = vrsqrt.f32 %v3186_v12 }
 0x909   :  { %3207 = vst.msk [vmem:[#allocation2] sm:$0xff] %vm192_vm1, %v3205_v13 }
 0x912   :  { %v3972_v17 = vpop.eup %3971 }
 0x913   :  { %v3190_v18 = vmul.f32 %v3972_v17, %v3174_v21 }
 0x915   :  { %v3198_v19 = vmul.f32 %v3360_v3, %v3190_v18 }
 0x917   :  { %v3206_v63 = vadd.f32 %v3361_v10, %v3198_v19 }
 0x919   :  { %3208 = vst.msk [vmem:[#allocation2 + $0x8] sm:$0xff] %vm192_vm1, %v3206_v63 }
 0x91a   :  { %3986 = shalt.err (!%p3983_p4)
}
 0x91b   :  { %s3987_s7 = scalar_lea.hbm %s4832_s18, 256 }
 0x91c   :  { %p3988_p5 = scmp.ne.s32.totalorder %s4832_s18, %s3987_s7  ;;  %p3991_p6 = scmp.lt.u32.totalorder %s3987_s7, %s4832_s18 }
 0x91e   :  { %p3993_p7 = pnand %p3991_p6, %p3988_p5 }
 0x920   :  { %3996 = shalt.err (!%p3993_p7)
}
 0x921   :  { %s4002_s3 = smov 128   ;;  %s4003_s28 = smov 8  }
 0x922   :  { %3220 = dma.vmem_to_hbm [thread:$0]  %s3215_s5, 256, %s4832_s18, [#allocation3], %s4002_s3, %s4002_s3, %s4003_s28  }
 0x923   :  { %3997 = dma.done.wait [#allocation3], 256  }
 0x924   :  { %3998 = vsyncadd [#allocation3], 4294967040 }
 0x925   :  { %3224 = vsyncpa [#allocation3], 1 }

</bundles_post_ra>
